<compile_context>
chip_gen: v5e
topology: v5e:2x2
jax: 0.10.0
libtpu: 0.0.40
codegen_flags: <defaults>
</compile_context>

<pallas_src>
import functools
import math

import jax
import jax.numpy as jnp
from jax import lax
from jax.experimental import pallas as pl
from jax.experimental.pallas import tpu as pltpu


# ----------------------------------------------------------------------------
# Packed-weight slab (one f32 operand for all FPSSAB parameters)
# ----------------------------------------------------------------------------

def _align8(n):
    return -(-n // 8) * 8


def _slab_layout(dim_in, dim_V):
    """Static (row, n_rows, n_cols) placement of every parameter in one 2D slab."""
    lay = {}
    r = 0

    def put(name, rows, cols, align):
        nonlocal r
        r = -(-r // align) * align
        lay[name] = (r, rows, cols)
        r += rows

    # Weight matrices start on 8-row (sublane-tile) boundaries.
    put("Wqkv0", dim_in, 3 * dim_V, 8)   # [Wq0 | Wk0 | Wv0]
    put("Wq1",   dim_in, dim_V,     8)
    put("Wkv1",  dim_V,  2 * dim_V, 8)   # [Wk1 | Wv1]
    put("Wo0",   dim_V,  dim_V,     8)
    put("Wo1",   dim_V,  dim_V,     8)
    # Biases: one sublane each.
    put("bqkv0", 1, 3 * dim_V, 8)
    put("bq1",   1, dim_V,     1)
    put("bkv1",  1, 2 * dim_V, 1)
    put("bo0",   1, dim_V,     1)
    put("bo1",   1, dim_V,     1)
    return lay, _align8(r), 3 * dim_V


def _pack_params(p0, p1, dim_in, dim_V):
    lay, R, C = _slab_layout(dim_in, dim_V)
    slab = jnp.zeros((R, C), jnp.float32)

    def put(slab, name, mat):
        r, rows, cols = lay[name]
        return slab.at[r:r + rows, 0:cols].set(
            mat.astype(jnp.float32).reshape(rows, cols))

    slab = put(slab, "Wqkv0", jnp.concatenate([p0["Wq"], p0["Wk"], p0["Wv"]], axis=1))
    slab = put(slab, "Wq1",   p1["Wq"])
    slab = put(slab, "Wkv1",  jnp.concatenate([p1["Wk"], p1["Wv"]], axis=1))
    slab = put(slab, "Wo0",   p0["Wo"])
    slab = put(slab, "Wo1",   p1["Wo"])
    slab = put(slab, "bqkv0", jnp.concatenate([p0["bq"], p0["bk"], p0["bv"]], axis=1))
    slab = put(slab, "bq1",   p1["bq"])
    slab = put(slab, "bkv1",  jnp.concatenate([p1["bk"], p1["bv"]], axis=1))
    slab = put(slab, "bo0",   p0["bo"])
    slab = put(slab, "bo1",   p1["bo"])
    return slab, lay


# ----------------------------------------------------------------------------
# In-kernel helpers
# ----------------------------------------------------------------------------

def _erf(x):
    # Abramowitz & Stegun 7.1.26 (|err| <= 1.5e-7): exact-GELU parity with torch
    # F.gelu(default) without depending on an erf lowering inside Mosaic.
    a1, a2, a3, a4, a5 = 0.254829592, -0.284496736, 1.421413741, -1.453152027, 1.061405429
    p = 0.3275911
    ax = jnp.abs(x)
    t = 1.0 / (1.0 + p * ax)
    poly = ((((a5 * t + a4) * t + a3) * t + a2) * t + a1) * t
    y = 1.0 - poly * jnp.exp(-(ax * ax))
    return jnp.where(x >= 0, y, -y)


def _gelu_exact(x):
    return 0.5 * x * (1.0 + _erf(x * (1.0 / math.sqrt(2.0))))


def _block_diag_mask(n_rows, n_cols, rows_per_block, cols_per_block, n_blocks):
    """Bool (n_rows, n_cols) mask, True on the h-th diagonal block.

    Built from 2-D iota + compares + adds only (no int division, no constants)."""
    ri = lax.broadcasted_iota(jnp.int32, (n_rows, n_cols), 0)
    ci = lax.broadcasted_iota(jnp.int32, (n_rows, n_cols), 1)
    rg = jnp.zeros((n_rows, n_cols), jnp.int32)
    cg = jnp.zeros((n_rows, n_cols), jnp.int32)
    for h in range(1, n_blocks):
        rg = rg + (ri >= h * rows_per_block).astype(jnp.int32)
        cg = cg + (ci >= h * cols_per_block).astype(jnp.int32)
    return rg == cg


def _attn_ff(q, k, v, wo, bo, bd_mask, ones_bd, num_heads, dim_V):
    """Head-fused MAB core (ln=False): O = Q + softmax_h(Q K_h^T/sqrt(dV)) V_h,
    out = O + gelu(O @ Wo + bo).  Heads live on the lane axis throughout."""
    H = num_heads
    # Block-diagonal K / V: rows h*nk:(h+1)*nk keep only feature cols of head h.
    k_bd = jnp.where(bd_mask, jnp.concatenate([k] * H, axis=0), 0.0)   # (H*nk, dV)
    v_bd = jnp.where(bd_mask, jnp.concatenate([v] * H, axis=0), 0.0)   # (H*nk, dV)

    # Scores for ALL heads in one matmul: s[q, h*nk+k] = Q_h[q,:] . K_h[k,:]
    s = lax.dot_general(q, k_bd, (((1,), (1,)), ((), ())),
                        preferred_element_type=jnp.float32) * (1.0 / math.sqrt(dim_V))
    s = s - jnp.max(s, axis=-1, keepdims=True)          # per-row const: per-head safe
    p = jnp.exp(s)
    # Per-head denominator broadcast back over each head's nk columns in one MXU op.
    denom = jnp.dot(p, ones_bd, preferred_element_type=jnp.float32)
    a = p * pl.reciprocal(denom, approx=True)           # EUP slot, not VALU divide
    o = q + jnp.dot(a, v_bd, preferred_element_type=jnp.float32)        # (nq, dV)
    ff = jnp.dot(o, wo, preferred_element_type=jnp.float32) + bo
    return o + _gelu_exact(ff)


def _fpssab_kernel(x_ref, idx_ref, w_ref, o_ref, *, num_heads, dim_V, lay):
    Bb, N, dim_in = x_ref.shape
    M = idx_ref.shape[1]
    H = num_heads
    hd = dim_V // H

    def w(name):
        r, rows, cols = lay[name]
        return w_ref[r:r + rows, 0:cols]                 # static slices -> free

    Wqkv0, bqkv0 = w("Wqkv0"), w("bqkv0")
    Wq1, bq1 = w("Wq1"), w("bq1")
    Wkv1, bkv1 = w("Wkv1"), w("bkv1")
    Wo0, bo0 = w("Wo0"), w("bo0")
    Wo1, bo1 = w("Wo1"), w("bo1")

    # Head-block structure masks (hoisted out of the batch loop).
    bd0 = _block_diag_mask(H * N, dim_V, N, hd, H)                       # MAB0: nk=N
    ones0 = _block_diag_mask(H * N, H * N, N, N, H).astype(jnp.float32)
    bd1 = _block_diag_mask(H * M, dim_V, M, hd, H)                       # MAB1: nk=M
    ones1 = _block_diag_mask(H * M, H * M, M, M, H).astype(jnp.float32)

    for bb in range(Bb):                                 # Bb is 1 (v7x) or B (v5e/v6e)
        x = x_ref[bb]                                    # (N, dim_in)
        sel = idx_ref[bb]                                # (M, 1) int32
        onehot = (lax.broadcasted_iota(jnp.int32, (M, N), 1) == sel).astype(jnp.float32)

        # ---- MAB0(ind, X): Q,K,V all projected from X in ONE matmul; the FPS
        # gather is the one-hot matmul applied to the projected Q rows.
        p0 = jnp.dot(x, Wqkv0, preferred_element_type=jnp.float32)       # (N, 3*dV)
        q0 = jnp.dot(onehot, p0[:, :dim_V],
                     preferred_element_type=jnp.float32) + bqkv0[:, :dim_V]   # (M, dV)
        k0 = p0[:, dim_V:2 * dim_V] + bqkv0[:, dim_V:2 * dim_V]
        v0 = p0[:, 2 * dim_V:] + bqkv0[:, 2 * dim_V:]
        h_mid = _attn_ff(q0, k0, v0, Wo0, bo0, bd0, ones0, H, dim_V)     # (M, dV)

        # ---- MAB1(X, H)
        q1 = jnp.dot(x, Wq1, preferred_element_type=jnp.float32) + bq1   # (N, dV)
        kv1 = jnp.dot(h_mid, Wkv1, preferred_element_type=jnp.float32) + bkv1
        k1 = kv1[:, :dim_V]
        v1 = kv1[:, dim_V:]
        out = _attn_ff(q1, k1, v1, Wo1, bo1, bd1, ones1, H, dim_V)       # (N, dV)

        # dim_out=32 < 128 lanes -> masked store; negligible here (lane-dense
        # output repacking only pays off at larger dim_out).
        o_ref[bb] = out.astype(o_ref.dtype)


# ----------------------------------------------------------------------------
# Wrapper
# ----------------------------------------------------------------------------

def _single_tensorcore_chip():
    """True for single-TC chips (v5e/v6e); False for v7x (2 TCs) / v4 megacore."""
    try:
        kind = jax.devices()[0].device_kind.lower()
    except Exception:
        return True
    return not any(t in kind for t in ("v7", "v4"))


def fpssab_forward(X, fps_idx, params_mab0, params_mab1, num_heads, fold_batch=None):
    """FPSSAB(X) = MAB1(X, MAB0(gather(X, fps_idx), X)) in a single pallas_call."""
    B, N, dim_in = X.shape
    M = fps_idx.shape[1]
    dim_V = params_mab0["Wq"].shape[1]

    if fold_batch is None:
        # v5e/v6e: one TensorCore -> grid is a serial loop; fold B into one step.
        # v7x/v4: keep grid=(B,) "parallel" so each core takes a batch element.
        fold_batch = _single_tensorcore_chip() or B == 1

    slab, lay = _pack_params(params_mab0, params_mab1, dim_in, dim_V)
    idx3 = fps_idx.astype(jnp.int32)[:, :, None]          # (B, M, 1) int32 -> VMEM
    R, C = slab.shape

    Bb = B if fold_batch else 1
    steps = 1 if fold_batch else B

    kernel = functools.partial(_fpssab_kernel, num_heads=num_heads,
                               dim_V=dim_V, lay=lay)

    return pl.pallas_call(
        kernel,
        out_shape=jax.ShapeDtypeStruct((B, N, dim_V), jnp.float32),
        grid=(steps,),
        in_specs=[
            pl.BlockSpec((Bb, N, dim_in), lambda b: (b, 0, 0)),   # X
            pl.BlockSpec((Bb, M, 1), lambda b: (b, 0, 0)),        # fps indices
            pl.BlockSpec((R, C), lambda b: (0, 0)),               # packed weights
        ],
        out_specs=pl.BlockSpec((Bb, N, dim_V), lambda b: (b, 0, 0)),
        compiler_params=pltpu.CompilerParams(
            dimension_semantics=("parallel",)),
    )(X, idx3, slab)


# ----------------------------------------------------------------------------
# Parameter init + pure-JAX reference (mirror of the PyTorch module)
# ----------------------------------------------------------------------------

def init_mab_params(key, dim_Q, dim_K, dim_V):
    """Deterministic synthetic parameters; weights stored as (in, out)."""
    ks = jax.random.split(key, 8)
    s = 0.1
    return {
        "Wq": s * jax.random.normal(ks[0], (dim_Q, dim_V), jnp.float32),
        "bq": s * jax.random.normal(ks[1], (1, dim_V), jnp.float32),
        "Wk": s * jax.random.normal(ks[2], (dim_K, dim_V), jnp.float32),
        "bk": s * jax.random.normal(ks[3], (1, dim_V), jnp.float32),
        "Wv": s * jax.random.normal(ks[4], (dim_K, dim_V), jnp.float32),
        "bv": s * jax.random.normal(ks[5], (1, dim_V), jnp.float32),
        "Wo": s * jax.random.normal(ks[6], (dim_V, dim_V), jnp.float32),
        "bo": s * jax.random.normal(ks[7], (1, dim_V), jnp.float32),
    }


def _mab_reference(Q, K, p, num_heads):
    """Pure-JAX mirror of the PyTorch MAB forward (ln=False)."""
    dv = p["Wq"].shape[1]
    hd = dv // num_heads
    Qp = Q @ p["Wq"] + p["bq"]
    Kp = K @ p["Wk"] + p["bk"]
    Vp = K @ p["Wv"] + p["bv"]
    B, Nq, _ = Qp.shape
    Nk = Kp.shape[1]
    Q4 = Qp.reshape(B, Nq, num_heads, hd)
    K4 = Kp.reshape(B, Nk, num_heads, hd)
    V4 = Vp.reshape(B, Nk, num_heads, hd)
    S = jnp.einsum("bqhd,bkhd->bhqk", Q4, K4) / math.sqrt(dv)
    A = jax.nn.softmax(S, axis=-1)
    O = (Q4 + jnp.einsum("bhqk,bkhd->bqhd", A, V4)).reshape(B, Nq, dv)
    return O + jax.nn.gelu(O @ p["Wo"] + p["bo"], approximate=False)


def fpssab_reference(X, fps_idx, params_mab0, params_mab1, num_heads):
    B, N, C = X.shape
    idx = jnp.broadcast_to(fps_idx[:, :, None], (B, fps_idx.shape[1], C))
    ind = jnp.take_along_axis(X, idx, axis=1)
    H = _mab_reference(ind, X, params_mab0, num_heads)
    return _mab_reference(X, H, params_mab1, num_heads)


if __name__ == "__main__":
    # Small shapes: batch=2, seq N=16, fps points M=8, dim_in=8, dim_out=32, heads=4.
    B, N, M = 2, 16, 8
    dim_in, dim_out, num_heads = 8, 32, 4

    key = jax.random.PRNGKey(0)
    kx, kidx, kp0, kp1 = jax.random.split(key, 4)

    X = jax.random.normal(kx, (B, N, dim_in), jnp.float32)
    fps_idx = jax.random.randint(kidx, (B, M), 0, N, jnp.int32)

    # mab0: MAB(dim_in, dim_in, dim_out) ; mab1: MAB(dim_in, dim_out, dim_out)
    params_mab0 = init_mab_params(kp0, dim_in, dim_in, dim_out)
    params_mab1 = init_mab_params(kp1, dim_in, dim_out, dim_out)

    fwd = jax.jit(functools.partial(fpssab_forward, num_heads=num_heads))
    out = jax.block_until_ready(fwd(X, fps_idx, params_mab0, params_mab1))
    assert out.shape == (B, N, dim_out), out.shape

    ref = fpssab_reference(X, fps_idx, params_mab0, params_mab1, num_heads)
    max_err = float(jnp.max(jnp.abs(out - ref)))
    assert max_err < 2e-2, f"mismatch vs reference: max |err| = {max_err}"

    print("KERNEL_OK")
</pallas_src>

<mosaic_0001>
module attributes {stable_mosaic.version = 11 : i64} {
  func.func @_fpssab_kernel(%arg0: i32, %arg1: memref<2x16x8xf32, #tpu.memory_space<vmem>>, %arg2: memref<2x8x1xi32, #tpu.memory_space<vmem>>, %arg3: memref<120x96xf32, #tpu.memory_space<vmem>>, %arg4: memref<2x16x32xf32, #tpu.memory_space<vmem>>) attributes {dimension_semantics = [#tpu.dimension_semantics<parallel>], iteration_bounds = array<i64: 1>, scalar_prefetch = 0 : i64, scratch_operands = 0 : i64, tpu.core_type = #tpu.core_type<tc>, window_params = [{transform_indices = @transform_0, window_bounds = array<i64: 2, 16, 8>}, {transform_indices = @transform_1, window_bounds = array<i64: 2, 8, 1>}, {pipeline_mode = #tpu.pipeline_mode<synchronous>, transform_indices = @transform_2, window_bounds = array<i64: 120, 96>}, {transform_indices = @transform_3, window_bounds = array<i64: 2, 16, 32>}]} {
    %c0 = arith.constant 0 : index
    %c0_0 = arith.constant 0 : index
    %0 = vector.load %arg3[%c0, %c0_0] : memref<120x96xf32, #tpu.memory_space<vmem>>, vector<8x96xf32>
    %c112 = arith.constant 112 : index
    %c0_1 = arith.constant 0 : index
    %1 = vector.load %arg3[%c112, %c0_1] : memref<120x96xf32, #tpu.memory_space<vmem>>, vector<1x96xf32>
    %c8 = arith.constant 8 : index
    %c0_2 = arith.constant 0 : index
    %2 = vector.load %arg3[%c8, %c0_2] : memref<120x96xf32, #tpu.memory_space<vmem>>, vector<8x32xf32>
    %c113 = arith.constant 113 : index
    %c0_3 = arith.constant 0 : index
    %3 = vector.load %arg3[%c113, %c0_3] : memref<120x96xf32, #tpu.memory_space<vmem>>, vector<1x32xf32>
    %c16 = arith.constant 16 : index
    %c0_4 = arith.constant 0 : index
    %4 = vector.load %arg3[%c16, %c0_4] : memref<120x96xf32, #tpu.memory_space<vmem>>, vector<32x64xf32>
    %c114 = arith.constant 114 : index
    %c0_5 = arith.constant 0 : index
    %5 = vector.load %arg3[%c114, %c0_5] : memref<120x96xf32, #tpu.memory_space<vmem>>, vector<1x64xf32>
    %c48 = arith.constant 48 : index
    %c0_6 = arith.constant 0 : index
    %6 = vector.load %arg3[%c48, %c0_6] : memref<120x96xf32, #tpu.memory_space<vmem>>, vector<32x32xf32>
    %c115 = arith.constant 115 : index
    %c0_7 = arith.constant 0 : index
    %7 = vector.load %arg3[%c115, %c0_7] : memref<120x96xf32, #tpu.memory_space<vmem>>, vector<1x32xf32>
    %c80 = arith.constant 80 : index
    %c0_8 = arith.constant 0 : index
    %8 = vector.load %arg3[%c80, %c0_8] : memref<120x96xf32, #tpu.memory_space<vmem>>, vector<32x32xf32>
    %c116 = arith.constant 116 : index
    %c0_9 = arith.constant 0 : index
    %9 = vector.load %arg3[%c116, %c0_9] : memref<120x96xf32, #tpu.memory_space<vmem>>, vector<1x32xf32>
    %10 = tpu.iota {dimensions = array<i32: 0>} : vector<64x32xi32>
    %11 = tpu.iota {dimensions = array<i32: 1>} : vector<64x32xi32>
    %c0_i32 = arith.constant 0 : i32
    %12 = vector.broadcast %c0_i32 : i32 to vector<64x32xi32>
    %c0_i32_10 = arith.constant 0 : i32
    %13 = vector.broadcast %c0_i32_10 : i32 to vector<64x32xi32>
    %c16_i32 = arith.constant 16 : i32
    %14 = vector.broadcast %c16_i32 : i32 to vector<64x32xi32>
    %15 = arith.cmpi sge, %10, %14 : vector<64x32xi32>
    %16 = arith.extui %15 : vector<64x32xi1> to vector<64x32xi32>
    %17 = arith.addi %12, %16 : vector<64x32xi32>
    %c8_i32 = arith.constant 8 : i32
    %18 = vector.broadcast %c8_i32 : i32 to vector<64x32xi32>
    %19 = arith.cmpi sge, %11, %18 : vector<64x32xi32>
    %20 = arith.extui %19 : vector<64x32xi1> to vector<64x32xi32>
    %21 = arith.addi %13, %20 : vector<64x32xi32>
    %c32_i32 = arith.constant 32 : i32
    %22 = vector.broadcast %c32_i32 : i32 to vector<64x32xi32>
    %23 = arith.cmpi sge, %10, %22 : vector<64x32xi32>
    %24 = arith.extui %23 : vector<64x32xi1> to vector<64x32xi32>
    %25 = arith.addi %17, %24 : vector<64x32xi32>
    %c16_i32_11 = arith.constant 16 : i32
    %26 = vector.broadcast %c16_i32_11 : i32 to vector<64x32xi32>
    %27 = arith.cmpi sge, %11, %26 : vector<64x32xi32>
    %28 = arith.extui %27 : vector<64x32xi1> to vector<64x32xi32>
    %29 = arith.addi %21, %28 : vector<64x32xi32>
    %c48_i32 = arith.constant 48 : i32
    %30 = vector.broadcast %c48_i32 : i32 to vector<64x32xi32>
    %31 = arith.cmpi sge, %10, %30 : vector<64x32xi32>
    %32 = arith.extui %31 : vector<64x32xi1> to vector<64x32xi32>
    %33 = arith.addi %25, %32 : vector<64x32xi32>
    %c24_i32 = arith.constant 24 : i32
    %34 = vector.broadcast %c24_i32 : i32 to vector<64x32xi32>
    %35 = arith.cmpi sge, %11, %34 : vector<64x32xi32>
    %36 = arith.extui %35 : vector<64x32xi1> to vector<64x32xi32>
    %37 = arith.addi %29, %36 : vector<64x32xi32>
    %38 = arith.cmpi eq, %33, %37 : vector<64x32xi32>
    %39 = tpu.iota {dimensions = array<i32: 0>} : vector<64x64xi32>
    %40 = tpu.iota {dimensions = array<i32: 1>} : vector<64x64xi32>
    %c0_i32_12 = arith.constant 0 : i32
    %41 = vector.broadcast %c0_i32_12 : i32 to vector<64x64xi32>
    %c0_i32_13 = arith.constant 0 : i32
    %42 = vector.broadcast %c0_i32_13 : i32 to vector<64x64xi32>
    %c16_i32_14 = arith.constant 16 : i32
    %43 = vector.broadcast %c16_i32_14 : i32 to vector<64x64xi32>
    %44 = arith.cmpi sge, %39, %43 : vector<64x64xi32>
    %45 = arith.extui %44 : vector<64x64xi1> to vector<64x64xi32>
    %46 = arith.addi %41, %45 : vector<64x64xi32>
    %c16_i32_15 = arith.constant 16 : i32
    %47 = vector.broadcast %c16_i32_15 : i32 to vector<64x64xi32>
    %48 = arith.cmpi sge, %40, %47 : vector<64x64xi32>
    %49 = arith.extui %48 : vector<64x64xi1> to vector<64x64xi32>
    %50 = arith.addi %42, %49 : vector<64x64xi32>
    %c32_i32_16 = arith.constant 32 : i32
    %51 = vector.broadcast %c32_i32_16 : i32 to vector<64x64xi32>
    %52 = arith.cmpi sge, %39, %51 : vector<64x64xi32>
    %53 = arith.extui %52 : vector<64x64xi1> to vector<64x64xi32>
    %54 = arith.addi %46, %53 : vector<64x64xi32>
    %c32_i32_17 = arith.constant 32 : i32
    %55 = vector.broadcast %c32_i32_17 : i32 to vector<64x64xi32>
    %56 = arith.cmpi sge, %40, %55 : vector<64x64xi32>
    %57 = arith.extui %56 : vector<64x64xi1> to vector<64x64xi32>
    %58 = arith.addi %50, %57 : vector<64x64xi32>
    %c48_i32_18 = arith.constant 48 : i32
    %59 = vector.broadcast %c48_i32_18 : i32 to vector<64x64xi32>
    %60 = arith.cmpi sge, %39, %59 : vector<64x64xi32>
    %61 = arith.extui %60 : vector<64x64xi1> to vector<64x64xi32>
    %62 = arith.addi %54, %61 : vector<64x64xi32>
    %c48_i32_19 = arith.constant 48 : i32
    %63 = vector.broadcast %c48_i32_19 : i32 to vector<64x64xi32>
    %64 = arith.cmpi sge, %40, %63 : vector<64x64xi32>
    %65 = arith.extui %64 : vector<64x64xi1> to vector<64x64xi32>
    %66 = arith.addi %58, %65 : vector<64x64xi32>
    %67 = arith.cmpi eq, %62, %66 : vector<64x64xi32>
    %68 = arith.extui %67 : vector<64x64xi1> to vector<64x64xi32>
    %69 = arith.sitofp %68 : vector<64x64xi32> to vector<64x64xf32>
    %70 = tpu.iota {dimensions = array<i32: 0>} : vector<32x32xi32>
    %71 = tpu.iota {dimensions = array<i32: 1>} : vector<32x32xi32>
    %c0_i32_20 = arith.constant 0 : i32
    %72 = vector.broadcast %c0_i32_20 : i32 to vector<32x32xi32>
    %c0_i32_21 = arith.constant 0 : i32
    %73 = vector.broadcast %c0_i32_21 : i32 to vector<32x32xi32>
    %c8_i32_22 = arith.constant 8 : i32
    %74 = vector.broadcast %c8_i32_22 : i32 to vector<32x32xi32>
    %75 = arith.cmpi sge, %70, %74 : vector<32x32xi32>
    %76 = arith.extui %75 : vector<32x32xi1> to vector<32x32xi32>
    %77 = arith.addi %72, %76 : vector<32x32xi32>
    %c8_i32_23 = arith.constant 8 : i32
    %78 = vector.broadcast %c8_i32_23 : i32 to vector<32x32xi32>
    %79 = arith.cmpi sge, %71, %78 : vector<32x32xi32>
    %80 = arith.extui %79 : vector<32x32xi1> to vector<32x32xi32>
    %81 = arith.addi %73, %80 : vector<32x32xi32>
    %c16_i32_24 = arith.constant 16 : i32
    %82 = vector.broadcast %c16_i32_24 : i32 to vector<32x32xi32>
    %83 = arith.cmpi sge, %70, %82 : vector<32x32xi32>
    %84 = arith.extui %83 : vector<32x32xi1> to vector<32x32xi32>
    %85 = arith.addi %77, %84 : vector<32x32xi32>
    %c16_i32_25 = arith.constant 16 : i32
    %86 = vector.broadcast %c16_i32_25 : i32 to vector<32x32xi32>
    %87 = arith.cmpi sge, %71, %86 : vector<32x32xi32>
    %88 = arith.extui %87 : vector<32x32xi1> to vector<32x32xi32>
    %89 = arith.addi %81, %88 : vector<32x32xi32>
    %c24_i32_26 = arith.constant 24 : i32
    %90 = vector.broadcast %c24_i32_26 : i32 to vector<32x32xi32>
    %91 = arith.cmpi sge, %70, %90 : vector<32x32xi32>
    %92 = arith.extui %91 : vector<32x32xi1> to vector<32x32xi32>
    %93 = arith.addi %85, %92 : vector<32x32xi32>
    %c24_i32_27 = arith.constant 24 : i32
    %94 = vector.broadcast %c24_i32_27 : i32 to vector<32x32xi32>
    %95 = arith.cmpi sge, %71, %94 : vector<32x32xi32>
    %96 = arith.extui %95 : vector<32x32xi1> to vector<32x32xi32>
    %97 = arith.addi %89, %96 : vector<32x32xi32>
    %98 = arith.cmpi eq, %93, %97 : vector<32x32xi32>
    %99 = tpu.iota {dimensions = array<i32: 0>} : vector<32x32xi32>
    %100 = tpu.iota {dimensions = array<i32: 1>} : vector<32x32xi32>
    %c0_i32_28 = arith.constant 0 : i32
    %101 = vector.broadcast %c0_i32_28 : i32 to vector<32x32xi32>
    %c0_i32_29 = arith.constant 0 : i32
    %102 = vector.broadcast %c0_i32_29 : i32 to vector<32x32xi32>
    %c8_i32_30 = arith.constant 8 : i32
    %103 = vector.broadcast %c8_i32_30 : i32 to vector<32x32xi32>
    %104 = arith.cmpi sge, %99, %103 : vector<32x32xi32>
    %105 = arith.extui %104 : vector<32x32xi1> to vector<32x32xi32>
    %106 = arith.addi %101, %105 : vector<32x32xi32>
    %c8_i32_31 = arith.constant 8 : i32
    %107 = vector.broadcast %c8_i32_31 : i32 to vector<32x32xi32>
    %108 = arith.cmpi sge, %100, %107 : vector<32x32xi32>
    %109 = arith.extui %108 : vector<32x32xi1> to vector<32x32xi32>
    %110 = arith.addi %102, %109 : vector<32x32xi32>
    %c16_i32_32 = arith.constant 16 : i32
    %111 = vector.broadcast %c16_i32_32 : i32 to vector<32x32xi32>
    %112 = arith.cmpi sge, %99, %111 : vector<32x32xi32>
    %113 = arith.extui %112 : vector<32x32xi1> to vector<32x32xi32>
    %114 = arith.addi %106, %113 : vector<32x32xi32>
    %c16_i32_33 = arith.constant 16 : i32
    %115 = vector.broadcast %c16_i32_33 : i32 to vector<32x32xi32>
    %116 = arith.cmpi sge, %100, %115 : vector<32x32xi32>
    %117 = arith.extui %116 : vector<32x32xi1> to vector<32x32xi32>
    %118 = arith.addi %110, %117 : vector<32x32xi32>
    %c24_i32_34 = arith.constant 24 : i32
    %119 = vector.broadcast %c24_i32_34 : i32 to vector<32x32xi32>
    %120 = arith.cmpi sge, %99, %119 : vector<32x32xi32>
    %121 = arith.extui %120 : vector<32x32xi1> to vector<32x32xi32>
    %122 = arith.addi %114, %121 : vector<32x32xi32>
    %c24_i32_35 = arith.constant 24 : i32
    %123 = vector.broadcast %c24_i32_35 : i32 to vector<32x32xi32>
    %124 = arith.cmpi sge, %100, %123 : vector<32x32xi32>
    %125 = arith.extui %124 : vector<32x32xi1> to vector<32x32xi32>
    %126 = arith.addi %118, %125 : vector<32x32xi32>
    %127 = arith.cmpi eq, %122, %126 : vector<32x32xi32>
    %128 = arith.extui %127 : vector<32x32xi1> to vector<32x32xi32>
    %129 = arith.sitofp %128 : vector<32x32xi32> to vector<32x32xf32>
    %c0_36 = arith.constant 0 : index
    %c0_37 = arith.constant 0 : index
    %c0_38 = arith.constant 0 : index
    %130 = vector.load %arg1[%c0_36, %c0_37, %c0_38] : memref<2x16x8xf32, #tpu.memory_space<vmem>>, vector<1x16x8xf32>
    %131 = vector.shape_cast %130 : vector<1x16x8xf32> to vector<16x8xf32>
    %c0_39 = arith.constant 0 : index
    %c0_40 = arith.constant 0 : index
    %c0_41 = arith.constant 0 : index
    %132 = vector.load %arg2[%c0_39, %c0_40, %c0_41] : memref<2x8x1xi32, #tpu.memory_space<vmem>>, vector<1x8x1xi32>
    %133 = vector.shape_cast %132 : vector<1x8x1xi32> to vector<8x1xi32>
    %134 = tpu.iota {dimensions = array<i32: 1>} : vector<8x16xi32>
    %135 = vector.broadcast %133 : vector<8x1xi32> to vector<8x16xi32>
    %136 = arith.cmpi eq, %134, %135 : vector<8x16xi32>
    %137 = arith.extui %136 : vector<8x16xi1> to vector<8x16xi32>
    %138 = arith.sitofp %137 : vector<8x16xi32> to vector<8x16xf32>
    %cst = arith.constant dense<0.000000e+00> : vector<16x96xf32>
    %139 = tpu.matmul %131, %0, %cst {dimension_numbers = #tpu.dot_dimension_numbers<[1], [0], [0], [1], [0, 0, 1, 1], [], []>} : vector<16x8xf32>, vector<8x96xf32>, vector<16x96xf32> -> vector<16x96xf32>
    %140 = vector.extract_strided_slice %139 {offsets = [0, 0], sizes = [16, 32], strides = [1, 1]} : vector<16x96xf32> to vector<16x32xf32>
    %cst_42 = arith.constant dense<0.000000e+00> : vector<8x32xf32>
    %141 = tpu.matmul %138, %140, %cst_42 {dimension_numbers = #tpu.dot_dimension_numbers<[1], [0], [0], [1], [0, 0, 1, 1], [], []>} : vector<8x16xf32>, vector<16x32xf32>, vector<8x32xf32> -> vector<8x32xf32>
    %142 = vector.extract_strided_slice %1 {offsets = [0, 0], sizes = [1, 32], strides = [1, 1]} : vector<1x96xf32> to vector<1x32xf32>
    %143 = vector.broadcast %142 : vector<1x32xf32> to vector<8x32xf32>
    %144 = arith.addf %141, %143 : vector<8x32xf32>
    %145 = vector.extract_strided_slice %139 {offsets = [0, 32], sizes = [16, 32], strides = [1, 1]} : vector<16x96xf32> to vector<16x32xf32>
    %146 = vector.extract_strided_slice %1 {offsets = [0, 32], sizes = [1, 32], strides = [1, 1]} : vector<1x96xf32> to vector<1x32xf32>
    %147 = vector.broadcast %146 : vector<1x32xf32> to vector<16x32xf32>
    %148 = arith.addf %145, %147 : vector<16x32xf32>
    %149 = vector.extract_strided_slice %139 {offsets = [0, 64], sizes = [16, 32], strides = [1, 1]} : vector<16x96xf32> to vector<16x32xf32>
    %150 = vector.extract_strided_slice %1 {offsets = [0, 64], sizes = [1, 32], strides = [1, 1]} : vector<1x96xf32> to vector<1x32xf32>
    %151 = vector.broadcast %150 : vector<1x32xf32> to vector<16x32xf32>
    %152 = arith.addf %149, %151 : vector<16x32xf32>
    %153 = tpu.concatenate %148, %148, %148, %148 in 0 : vector<16x32xf32>, vector<16x32xf32>, vector<16x32xf32>, vector<16x32xf32> -> vector<64x32xf32>
    %cst_43 = arith.constant 0.000000e+00 : f32
    %154 = vector.broadcast %cst_43 : f32 to vector<64x32xf32>
    %155 = arith.select %38, %153, %154 : vector<64x32xi1>, vector<64x32xf32>
    %156 = tpu.concatenate %152, %152, %152, %152 in 0 : vector<16x32xf32>, vector<16x32xf32>, vector<16x32xf32>, vector<16x32xf32> -> vector<64x32xf32>
    %cst_44 = arith.constant 0.000000e+00 : f32
    %157 = vector.broadcast %cst_44 : f32 to vector<64x32xf32>
    %158 = arith.select %38, %156, %157 : vector<64x32xi1>, vector<64x32xf32>
    %cst_45 = arith.constant dense<0.000000e+00> : vector<8x64xf32>
    %159 = tpu.matmul %144, %155, %cst_45 {dimension_numbers = #tpu.dot_dimension_numbers<[1], [1], [0], [0], [0, 0, 1, 0], [], []>} : vector<8x32xf32>, vector<64x32xf32>, vector<8x64xf32> -> vector<8x64xf32>
    %cst_46 = arith.constant 0.176776692 : f32
    %160 = vector.broadcast %cst_46 : f32 to vector<8x64xf32>
    %161 = arith.mulf %159, %160 : vector<8x64xf32>
    %cst_47 = arith.constant dense<0xFF800000> : vector<8xf32>
    %162 = vector.multi_reduction <maximumf>, %161, %cst_47 [1] : vector<8x64xf32> to vector<8xf32>
    %163 = vector.shape_cast %162 : vector<8xf32> to vector<8x1xf32>
    %164 = vector.broadcast %163 : vector<8x1xf32> to vector<8x64xf32>
    %165 = arith.subf %161, %164 : vector<8x64xf32>
    %166 = math.exp %165 : vector<8x64xf32>
    %cst_48 = arith.constant dense<0.000000e+00> : vector<8x64xf32>
    %167 = tpu.matmul %166, %69, %cst_48 {dimension_numbers = #tpu.dot_dimension_numbers<[1], [0], [0], [1], [0, 0, 1, 1], [], []>} : vector<8x64xf32>, vector<64x64xf32>, vector<8x64xf32> -> vector<8x64xf32>
    %168 = tpu.reciprocal %167 {approx = true} : vector<8x64xf32> -> vector<8x64xf32>
    %169 = arith.mulf %166, %168 : vector<8x64xf32>
    %cst_49 = arith.constant dense<0.000000e+00> : vector<8x32xf32>
    %170 = tpu.matmul %169, %158, %cst_49 {dimension_numbers = #tpu.dot_dimension_numbers<[1], [0], [0], [1], [0, 0, 1, 1], [], []>} : vector<8x64xf32>, vector<64x32xf32>, vector<8x32xf32> -> vector<8x32xf32>
    %171 = arith.addf %144, %170 : vector<8x32xf32>
    %cst_50 = arith.constant dense<0.000000e+00> : vector<8x32xf32>
    %172 = tpu.matmul %171, %6, %cst_50 {dimension_numbers = #tpu.dot_dimension_numbers<[1], [0], [0], [1], [0, 0, 1, 1], [], []>} : vector<8x32xf32>, vector<32x32xf32>, vector<8x32xf32> -> vector<8x32xf32>
    %173 = vector.broadcast %7 : vector<1x32xf32> to vector<8x32xf32>
    %174 = arith.addf %172, %173 : vector<8x32xf32>
    %cst_51 = arith.constant 5.000000e-01 : f32
    %175 = vector.broadcast %cst_51 : f32 to vector<8x32xf32>
    %176 = arith.mulf %175, %174 : vector<8x32xf32>
    %cst_52 = arith.constant 0.707106769 : f32
    %177 = vector.broadcast %cst_52 : f32 to vector<8x32xf32>
    %178 = arith.mulf %174, %177 : vector<8x32xf32>
    %179 = math.absf %178 : vector<8x32xf32>
    %cst_53 = arith.constant 0.327591091 : f32
    %180 = vector.broadcast %cst_53 : f32 to vector<8x32xf32>
    %181 = arith.mulf %180, %179 : vector<8x32xf32>
    %cst_54 = arith.constant 1.000000e+00 : f32
    %182 = vector.broadcast %cst_54 : f32 to vector<8x32xf32>
    %183 = arith.addf %182, %181 : vector<8x32xf32>
    %cst_55 = arith.constant 1.000000e+00 : f32
    %184 = vector.broadcast %cst_55 : f32 to vector<8x32xf32>
    %185 = arith.divf %184, %183 : vector<8x32xf32>
    %cst_56 = arith.constant 1.06140542 : f32
    %186 = vector.broadcast %cst_56 : f32 to vector<8x32xf32>
    %187 = arith.mulf %186, %185 : vector<8x32xf32>
    %cst_57 = arith.constant -1.45315206 : f32
    %188 = vector.broadcast %cst_57 : f32 to vector<8x32xf32>
    %189 = arith.addf %187, %188 : vector<8x32xf32>
    %190 = arith.mulf %189, %185 : vector<8x32xf32>
    %cst_58 = arith.constant 1.42141378 : f32
    %191 = vector.broadcast %cst_58 : f32 to vector<8x32xf32>
    %192 = arith.addf %190, %191 : vector<8x32xf32>
    %193 = arith.mulf %192, %185 : vector<8x32xf32>
    %cst_59 = arith.constant -0.284496725 : f32
    %194 = vector.broadcast %cst_59 : f32 to vector<8x32xf32>
    %195 = arith.addf %193, %194 : vector<8x32xf32>
    %196 = arith.mulf %195, %185 : vector<8x32xf32>
    %cst_60 = arith.constant 0.254829586 : f32
    %197 = vector.broadcast %cst_60 : f32 to vector<8x32xf32>
    %198 = arith.addf %196, %197 : vector<8x32xf32>
    %199 = arith.mulf %198, %185 : vector<8x32xf32>
    %200 = arith.mulf %179, %179 : vector<8x32xf32>
    %cst_61 = arith.constant 0.000000e+00 : f32
    %201 = vector.broadcast %cst_61 : f32 to vector<8x32xf32>
    %202 = arith.subf %201, %200 : vector<8x32xf32>
    %203 = math.exp %202 : vector<8x32xf32>
    %204 = arith.mulf %199, %203 : vector<8x32xf32>
    %cst_62 = arith.constant 1.000000e+00 : f32
    %205 = vector.broadcast %cst_62 : f32 to vector<8x32xf32>
    %206 = arith.subf %205, %204 : vector<8x32xf32>
    %cst_63 = arith.constant 0.000000e+00 : f32
    %207 = vector.broadcast %cst_63 : f32 to vector<8x32xf32>
    %208 = arith.cmpf oge, %178, %207 : vector<8x32xf32>
    %cst_64 = arith.constant 0.000000e+00 : f32
    %209 = vector.broadcast %cst_64 : f32 to vector<8x32xf32>
    %210 = arith.subf %209, %206 : vector<8x32xf32>
    %211 = arith.select %208, %206, %210 : vector<8x32xi1>, vector<8x32xf32>
    %cst_65 = arith.constant 1.000000e+00 : f32
    %212 = vector.broadcast %cst_65 : f32 to vector<8x32xf32>
    %213 = arith.addf %212, %211 : vector<8x32xf32>
    %214 = arith.mulf %176, %213 : vector<8x32xf32>
    %215 = arith.addf %171, %214 : vector<8x32xf32>
    %cst_66 = arith.constant dense<0.000000e+00> : vector<16x32xf32>
    %216 = tpu.matmul %131, %2, %cst_66 {dimension_numbers = #tpu.dot_dimension_numbers<[1], [0], [0], [1], [0, 0, 1, 1], [], []>} : vector<16x8xf32>, vector<8x32xf32>, vector<16x32xf32> -> vector<16x32xf32>
    %217 = vector.broadcast %3 : vector<1x32xf32> to vector<16x32xf32>
    %218 = arith.addf %216, %217 : vector<16x32xf32>
    %cst_67 = arith.constant dense<0.000000e+00> : vector<8x64xf32>
    %219 = tpu.matmul %215, %4, %cst_67 {dimension_numbers = #tpu.dot_dimension_numbers<[1], [0], [0], [1], [0, 0, 1, 1], [], []>} : vector<8x32xf32>, vector<32x64xf32>, vector<8x64xf32> -> vector<8x64xf32>
    %220 = vector.broadcast %5 : vector<1x64xf32> to vector<8x64xf32>
    %221 = arith.addf %219, %220 : vector<8x64xf32>
    %222 = vector.extract_strided_slice %221 {offsets = [0, 0], sizes = [8, 32], strides = [1, 1]} : vector<8x64xf32> to vector<8x32xf32>
    %223 = vector.extract_strided_slice %221 {offsets = [0, 32], sizes = [8, 32], strides = [1, 1]} : vector<8x64xf32> to vector<8x32xf32>
    %224 = tpu.concatenate %222, %222, %222, %222 in 0 : vector<8x32xf32>, vector<8x32xf32>, vector<8x32xf32>, vector<8x32xf32> -> vector<32x32xf32>
    %cst_68 = arith.constant 0.000000e+00 : f32
    %225 = vector.broadcast %cst_68 : f32 to vector<32x32xf32>
    %226 = arith.select %98, %224, %225 : vector<32x32xi1>, vector<32x32xf32>
    %227 = tpu.concatenate %223, %223, %223, %223 in 0 : vector<8x32xf32>, vector<8x32xf32>, vector<8x32xf32>, vector<8x32xf32> -> vector<32x32xf32>
    %cst_69 = arith.constant 0.000000e+00 : f32
    %228 = vector.broadcast %cst_69 : f32 to vector<32x32xf32>
    %229 = arith.select %98, %227, %228 : vector<32x32xi1>, vector<32x32xf32>
    %cst_70 = arith.constant dense<0.000000e+00> : vector<16x32xf32>
    %230 = tpu.matmul %218, %226, %cst_70 {dimension_numbers = #tpu.dot_dimension_numbers<[1], [1], [0], [0], [0, 0, 1, 0], [], []>} : vector<16x32xf32>, vector<32x32xf32>, vector<16x32xf32> -> vector<16x32xf32>
    %cst_71 = arith.constant 0.176776692 : f32
    %231 = vector.broadcast %cst_71 : f32 to vector<16x32xf32>
    %232 = arith.mulf %230, %231 : vector<16x32xf32>
    %cst_72 = arith.constant dense<0xFF800000> : vector<16xf32>
    %233 = vector.multi_reduction <maximumf>, %232, %cst_72 [1] : vector<16x32xf32> to vector<16xf32>
    %234 = vector.shape_cast %233 : vector<16xf32> to vector<16x1xf32>
    %235 = vector.broadcast %234 : vector<16x1xf32> to vector<16x32xf32>
    %236 = arith.subf %232, %235 : vector<16x32xf32>
    %237 = math.exp %236 : vector<16x32xf32>
    %cst_73 = arith.constant dense<0.000000e+00> : vector<16x32xf32>
    %238 = tpu.matmul %237, %129, %cst_73 {dimension_numbers = #tpu.dot_dimension_numbers<[1], [0], [0], [1], [0, 0, 1, 1], [], []>} : vector<16x32xf32>, vector<32x32xf32>, vector<16x32xf32> -> vector<16x32xf32>
    %239 = tpu.reciprocal %238 {approx = true} : vector<16x32xf32> -> vector<16x32xf32>
    %240 = arith.mulf %237, %239 : vector<16x32xf32>
    %cst_74 = arith.constant dense<0.000000e+00> : vector<16x32xf32>
    %241 = tpu.matmul %240, %229, %cst_74 {dimension_numbers = #tpu.dot_dimension_numbers<[1], [0], [0], [1], [0, 0, 1, 1], [], []>} : vector<16x32xf32>, vector<32x32xf32>, vector<16x32xf32> -> vector<16x32xf32>
    %242 = arith.addf %218, %241 : vector<16x32xf32>
    %cst_75 = arith.constant dense<0.000000e+00> : vector<16x32xf32>
    %243 = tpu.matmul %242, %8, %cst_75 {dimension_numbers = #tpu.dot_dimension_numbers<[1], [0], [0], [1], [0, 0, 1, 1], [], []>} : vector<16x32xf32>, vector<32x32xf32>, vector<16x32xf32> -> vector<16x32xf32>
    %244 = vector.broadcast %9 : vector<1x32xf32> to vector<16x32xf32>
    %245 = arith.addf %243, %244 : vector<16x32xf32>
    %cst_76 = arith.constant 5.000000e-01 : f32
    %246 = vector.broadcast %cst_76 : f32 to vector<16x32xf32>
    %247 = arith.mulf %246, %245 : vector<16x32xf32>
    %cst_77 = arith.constant 0.707106769 : f32
    %248 = vector.broadcast %cst_77 : f32 to vector<16x32xf32>
    %249 = arith.mulf %245, %248 : vector<16x32xf32>
    %250 = math.absf %249 : vector<16x32xf32>
    %cst_78 = arith.constant 0.327591091 : f32
    %251 = vector.broadcast %cst_78 : f32 to vector<16x32xf32>
    %252 = arith.mulf %251, %250 : vector<16x32xf32>
    %cst_79 = arith.constant 1.000000e+00 : f32
    %253 = vector.broadcast %cst_79 : f32 to vector<16x32xf32>
    %254 = arith.addf %253, %252 : vector<16x32xf32>
    %cst_80 = arith.constant 1.000000e+00 : f32
    %255 = vector.broadcast %cst_80 : f32 to vector<16x32xf32>
    %256 = arith.divf %255, %254 : vector<16x32xf32>
    %cst_81 = arith.constant 1.06140542 : f32
    %257 = vector.broadcast %cst_81 : f32 to vector<16x32xf32>
    %258 = arith.mulf %257, %256 : vector<16x32xf32>
    %cst_82 = arith.constant -1.45315206 : f32
    %259 = vector.broadcast %cst_82 : f32 to vector<16x32xf32>
    %260 = arith.addf %258, %259 : vector<16x32xf32>
    %261 = arith.mulf %260, %256 : vector<16x32xf32>
    %cst_83 = arith.constant 1.42141378 : f32
    %262 = vector.broadcast %cst_83 : f32 to vector<16x32xf32>
    %263 = arith.addf %261, %262 : vector<16x32xf32>
    %264 = arith.mulf %263, %256 : vector<16x32xf32>
    %cst_84 = arith.constant -0.284496725 : f32
    %265 = vector.broadcast %cst_84 : f32 to vector<16x32xf32>
    %266 = arith.addf %264, %265 : vector<16x32xf32>
    %267 = arith.mulf %266, %256 : vector<16x32xf32>
    %cst_85 = arith.constant 0.254829586 : f32
    %268 = vector.broadcast %cst_85 : f32 to vector<16x32xf32>
    %269 = arith.addf %267, %268 : vector<16x32xf32>
    %270 = arith.mulf %269, %256 : vector<16x32xf32>
    %271 = arith.mulf %250, %250 : vector<16x32xf32>
    %cst_86 = arith.constant 0.000000e+00 : f32
    %272 = vector.broadcast %cst_86 : f32 to vector<16x32xf32>
    %273 = arith.subf %272, %271 : vector<16x32xf32>
    %274 = math.exp %273 : vector<16x32xf32>
    %275 = arith.mulf %270, %274 : vector<16x32xf32>
    %cst_87 = arith.constant 1.000000e+00 : f32
    %276 = vector.broadcast %cst_87 : f32 to vector<16x32xf32>
    %277 = arith.subf %276, %275 : vector<16x32xf32>
    %cst_88 = arith.constant 0.000000e+00 : f32
    %278 = vector.broadcast %cst_88 : f32 to vector<16x32xf32>
    %279 = arith.cmpf oge, %249, %278 : vector<16x32xf32>
    %cst_89 = arith.constant 0.000000e+00 : f32
    %280 = vector.broadcast %cst_89 : f32 to vector<16x32xf32>
    %281 = arith.subf %280, %277 : vector<16x32xf32>
    %282 = arith.select %279, %277, %281 : vector<16x32xi1>, vector<16x32xf32>
    %cst_90 = arith.constant 1.000000e+00 : f32
    %283 = vector.broadcast %cst_90 : f32 to vector<16x32xf32>
    %284 = arith.addf %283, %282 : vector<16x32xf32>
    %285 = arith.mulf %247, %284 : vector<16x32xf32>
    %286 = arith.addf %242, %285 : vector<16x32xf32>
    %c0_91 = arith.constant 0 : index
    %c0_92 = arith.constant 0 : index
    %c0_93 = arith.constant 0 : index
    %287 = vector.load %arg4[%c0_91, %c0_92, %c0_93] : memref<2x16x32xf32, #tpu.memory_space<vmem>>, vector<1x16x32xf32>
    %288 = vector.shape_cast %287 : vector<1x16x32xf32> to vector<16x32xf32>
    %289 = vector.shape_cast %286 : vector<16x32xf32> to vector<1x16x32xf32>
    tpu.vector_store %arg4[%c0_91, %c0_92, %c0_93], %289 {strides = array<i32>} : memref<2x16x32xf32, #tpu.memory_space<vmem>>, vector<1x16x32xf32>,
    %c1 = arith.constant 1 : index
    %c0_94 = arith.constant 0 : index
    %c0_95 = arith.constant 0 : index
    %290 = vector.load %arg1[%c1, %c0_94, %c0_95] : memref<2x16x8xf32, #tpu.memory_space<vmem>>, vector<1x16x8xf32>
    %291 = vector.shape_cast %290 : vector<1x16x8xf32> to vector<16x8xf32>
    %c1_96 = arith.constant 1 : index
    %c0_97 = arith.constant 0 : index
    %c0_98 = arith.constant 0 : index
    %292 = vector.load %arg2[%c1_96, %c0_97, %c0_98] : memref<2x8x1xi32, #tpu.memory_space<vmem>>, vector<1x8x1xi32>
    %293 = vector.shape_cast %292 : vector<1x8x1xi32> to vector<8x1xi32>
    %294 = tpu.iota {dimensions = array<i32: 1>} : vector<8x16xi32>
    %295 = vector.broadcast %293 : vector<8x1xi32> to vector<8x16xi32>
    %296 = arith.cmpi eq, %294, %295 : vector<8x16xi32>
    %297 = arith.extui %296 : vector<8x16xi1> to vector<8x16xi32>
    %298 = arith.sitofp %297 : vector<8x16xi32> to vector<8x16xf32>
    %cst_99 = arith.constant dense<0.000000e+00> : vector<16x96xf32>
    %299 = tpu.matmul %291, %0, %cst_99 {dimension_numbers = #tpu.dot_dimension_numbers<[1], [0], [0], [1], [0, 0, 1, 1], [], []>} : vector<16x8xf32>, vector<8x96xf32>, vector<16x96xf32> -> vector<16x96xf32>
    %300 = vector.extract_strided_slice %299 {offsets = [0, 0], sizes = [16, 32], strides = [1, 1]} : vector<16x96xf32> to vector<16x32xf32>
    %cst_100 = arith.constant dense<0.000000e+00> : vector<8x32xf32>
    %301 = tpu.matmul %298, %300, %cst_100 {dimension_numbers = #tpu.dot_dimension_numbers<[1], [0], [0], [1], [0, 0, 1, 1], [], []>} : vector<8x16xf32>, vector<16x32xf32>, vector<8x32xf32> -> vector<8x32xf32>
    %302 = vector.extract_strided_slice %1 {offsets = [0, 0], sizes = [1, 32], strides = [1, 1]} : vector<1x96xf32> to vector<1x32xf32>
    %303 = vector.broadcast %302 : vector<1x32xf32> to vector<8x32xf32>
    %304 = arith.addf %301, %303 : vector<8x32xf32>
    %305 = vector.extract_strided_slice %299 {offsets = [0, 32], sizes = [16, 32], strides = [1, 1]} : vector<16x96xf32> to vector<16x32xf32>
    %306 = vector.extract_strided_slice %1 {offsets = [0, 32], sizes = [1, 32], strides = [1, 1]} : vector<1x96xf32> to vector<1x32xf32>
    %307 = vector.broadcast %306 : vector<1x32xf32> to vector<16x32xf32>
    %308 = arith.addf %305, %307 : vector<16x32xf32>
    %309 = vector.extract_strided_slice %299 {offsets = [0, 64], sizes = [16, 32], strides = [1, 1]} : vector<16x96xf32> to vector<16x32xf32>
    %310 = vector.extract_strided_slice %1 {offsets = [0, 64], sizes = [1, 32], strides = [1, 1]} : vector<1x96xf32> to vector<1x32xf32>
    %311 = vector.broadcast %310 : vector<1x32xf32> to vector<16x32xf32>
    %312 = arith.addf %309, %311 : vector<16x32xf32>
    %313 = tpu.concatenate %308, %308, %308, %308 in 0 : vector<16x32xf32>, vector<16x32xf32>, vector<16x32xf32>, vector<16x32xf32> -> vector<64x32xf32>
    %cst_101 = arith.constant 0.000000e+00 : f32
    %314 = vector.broadcast %cst_101 : f32 to vector<64x32xf32>
    %315 = arith.select %38, %313, %314 : vector<64x32xi1>, vector<64x32xf32>
    %316 = tpu.concatenate %312, %312, %312, %312 in 0 : vector<16x32xf32>, vector<16x32xf32>, vector<16x32xf32>, vector<16x32xf32> -> vector<64x32xf32>
    %cst_102 = arith.constant 0.000000e+00 : f32
    %317 = vector.broadcast %cst_102 : f32 to vector<64x32xf32>
    %318 = arith.select %38, %316, %317 : vector<64x32xi1>, vector<64x32xf32>
    %cst_103 = arith.constant dense<0.000000e+00> : vector<8x64xf32>
    %319 = tpu.matmul %304, %315, %cst_103 {dimension_numbers = #tpu.dot_dimension_numbers<[1], [1], [0], [0], [0, 0, 1, 0], [], []>} : vector<8x32xf32>, vector<64x32xf32>, vector<8x64xf32> -> vector<8x64xf32>
    %cst_104 = arith.constant 0.176776692 : f32
    %320 = vector.broadcast %cst_104 : f32 to vector<8x64xf32>
    %321 = arith.mulf %319, %320 : vector<8x64xf32>
    %cst_105 = arith.constant dense<0xFF800000> : vector<8xf32>
    %322 = vector.multi_reduction <maximumf>, %321, %cst_105 [1] : vector<8x64xf32> to vector<8xf32>
    %323 = vector.shape_cast %322 : vector<8xf32> to vector<8x1xf32>
    %324 = vector.broadcast %323 : vector<8x1xf32> to vector<8x64xf32>
    %325 = arith.subf %321, %324 : vector<8x64xf32>
    %326 = math.exp %325 : vector<8x64xf32>
    %cst_106 = arith.constant dense<0.000000e+00> : vector<8x64xf32>
    %327 = tpu.matmul %326, %69, %cst_106 {dimension_numbers = #tpu.dot_dimension_numbers<[1], [0], [0], [1], [0, 0, 1, 1], [], []>} : vector<8x64xf32>, vector<64x64xf32>, vector<8x64xf32> -> vector<8x64xf32>
    %328 = tpu.reciprocal %327 {approx = true} : vector<8x64xf32> -> vector<8x64xf32>
    %329 = arith.mulf %326, %328 : vector<8x64xf32>
    %cst_107 = arith.constant dense<0.000000e+00> : vector<8x32xf32>
    %330 = tpu.matmul %329, %318, %cst_107 {dimension_numbers = #tpu.dot_dimension_numbers<[1], [0], [0], [1], [0, 0, 1, 1], [], []>} : vector<8x64xf32>, vector<64x32xf32>, vector<8x32xf32> -> vector<8x32xf32>
    %331 = arith.addf %304, %330 : vector<8x32xf32>
    %cst_108 = arith.constant dense<0.000000e+00> : vector<8x32xf32>
    %332 = tpu.matmul %331, %6, %cst_108 {dimension_numbers = #tpu.dot_dimension_numbers<[1], [0], [0], [1], [0, 0, 1, 1], [], []>} : vector<8x32xf32>, vector<32x32xf32>, vector<8x32xf32> -> vector<8x32xf32>
    %333 = vector.broadcast %7 : vector<1x32xf32> to vector<8x32xf32>
    %334 = arith.addf %332, %333 : vector<8x32xf32>
    %cst_109 = arith.constant 5.000000e-01 : f32
    %335 = vector.broadcast %cst_109 : f32 to vector<8x32xf32>
    %336 = arith.mulf %335, %334 : vector<8x32xf32>
    %cst_110 = arith.constant 0.707106769 : f32
    %337 = vector.broadcast %cst_110 : f32 to vector<8x32xf32>
    %338 = arith.mulf %334, %337 : vector<8x32xf32>
    %339 = math.absf %338 : vector<8x32xf32>
    %cst_111 = arith.constant 0.327591091 : f32
    %340 = vector.broadcast %cst_111 : f32 to vector<8x32xf32>
    %341 = arith.mulf %340, %339 : vector<8x32xf32>
    %cst_112 = arith.constant 1.000000e+00 : f32
    %342 = vector.broadcast %cst_112 : f32 to vector<8x32xf32>
    %343 = arith.addf %342, %341 : vector<8x32xf32>
    %cst_113 = arith.constant 1.000000e+00 : f32
    %344 = vector.broadcast %cst_113 : f32 to vector<8x32xf32>
    %345 = arith.divf %344, %343 : vector<8x32xf32>
    %cst_114 = arith.constant 1.06140542 : f32
    %346 = vector.broadcast %cst_114 : f32 to vector<8x32xf32>
    %347 = arith.mulf %346, %345 : vector<8x32xf32>
    %cst_115 = arith.constant -1.45315206 : f32
    %348 = vector.broadcast %cst_115 : f32 to vector<8x32xf32>
    %349 = arith.addf %347, %348 : vector<8x32xf32>
    %350 = arith.mulf %349, %345 : vector<8x32xf32>
    %cst_116 = arith.constant 1.42141378 : f32
    %351 = vector.broadcast %cst_116 : f32 to vector<8x32xf32>
    %352 = arith.addf %350, %351 : vector<8x32xf32>
    %353 = arith.mulf %352, %345 : vector<8x32xf32>
    %cst_117 = arith.constant -0.284496725 : f32
    %354 = vector.broadcast %cst_117 : f32 to vector<8x32xf32>
    %355 = arith.addf %353, %354 : vector<8x32xf32>
    %356 = arith.mulf %355, %345 : vector<8x32xf32>
    %cst_118 = arith.constant 0.254829586 : f32
    %357 = vector.broadcast %cst_118 : f32 to vector<8x32xf32>
    %358 = arith.addf %356, %357 : vector<8x32xf32>
    %359 = arith.mulf %358, %345 : vector<8x32xf32>
    %360 = arith.mulf %339, %339 : vector<8x32xf32>
    %cst_119 = arith.constant 0.000000e+00 : f32
    %361 = vector.broadcast %cst_119 : f32 to vector<8x32xf32>
    %362 = arith.subf %361, %360 : vector<8x32xf32>
    %363 = math.exp %362 : vector<8x32xf32>
    %364 = arith.mulf %359, %363 : vector<8x32xf32>
    %cst_120 = arith.constant 1.000000e+00 : f32
    %365 = vector.broadcast %cst_120 : f32 to vector<8x32xf32>
    %366 = arith.subf %365, %364 : vector<8x32xf32>
    %cst_121 = arith.constant 0.000000e+00 : f32
    %367 = vector.broadcast %cst_121 : f32 to vector<8x32xf32>
    %368 = arith.cmpf oge, %338, %367 : vector<8x32xf32>
    %cst_122 = arith.constant 0.000000e+00 : f32
    %369 = vector.broadcast %cst_122 : f32 to vector<8x32xf32>
    %370 = arith.subf %369, %366 : vector<8x32xf32>
    %371 = arith.select %368, %366, %370 : vector<8x32xi1>, vector<8x32xf32>
    %cst_123 = arith.constant 1.000000e+00 : f32
    %372 = vector.broadcast %cst_123 : f32 to vector<8x32xf32>
    %373 = arith.addf %372, %371 : vector<8x32xf32>
    %374 = arith.mulf %336, %373 : vector<8x32xf32>
    %375 = arith.addf %331, %374 : vector<8x32xf32>
    %cst_124 = arith.constant dense<0.000000e+00> : vector<16x32xf32>
    %376 = tpu.matmul %291, %2, %cst_124 {dimension_numbers = #tpu.dot_dimension_numbers<[1], [0], [0], [1], [0, 0, 1, 1], [], []>} : vector<16x8xf32>, vector<8x32xf32>, vector<16x32xf32> -> vector<16x32xf32>
    %377 = vector.broadcast %3 : vector<1x32xf32> to vector<16x32xf32>
    %378 = arith.addf %376, %377 : vector<16x32xf32>
    %cst_125 = arith.constant dense<0.000000e+00> : vector<8x64xf32>
    %379 = tpu.matmul %375, %4, %cst_125 {dimension_numbers = #tpu.dot_dimension_numbers<[1], [0], [0], [1], [0, 0, 1, 1], [], []>} : vector<8x32xf32>, vector<32x64xf32>, vector<8x64xf32> -> vector<8x64xf32>
    %380 = vector.broadcast %5 : vector<1x64xf32> to vector<8x64xf32>
    %381 = arith.addf %379, %380 : vector<8x64xf32>
    %382 = vector.extract_strided_slice %381 {offsets = [0, 0], sizes = [8, 32], strides = [1, 1]} : vector<8x64xf32> to vector<8x32xf32>
    %383 = vector.extract_strided_slice %381 {offsets = [0, 32], sizes = [8, 32], strides = [1, 1]} : vector<8x64xf32> to vector<8x32xf32>
    %384 = tpu.concatenate %382, %382, %382, %382 in 0 : vector<8x32xf32>, vector<8x32xf32>, vector<8x32xf32>, vector<8x32xf32> -> vector<32x32xf32>
    %cst_126 = arith.constant 0.000000e+00 : f32
    %385 = vector.broadcast %cst_126 : f32 to vector<32x32xf32>
    %386 = arith.select %98, %384, %385 : vector<32x32xi1>, vector<32x32xf32>
    %387 = tpu.concatenate %383, %383, %383, %383 in 0 : vector<8x32xf32>, vector<8x32xf32>, vector<8x32xf32>, vector<8x32xf32> -> vector<32x32xf32>
    %cst_127 = arith.constant 0.000000e+00 : f32
    %388 = vector.broadcast %cst_127 : f32 to vector<32x32xf32>
    %389 = arith.select %98, %387, %388 : vector<32x32xi1>, vector<32x32xf32>
    %cst_128 = arith.constant dense<0.000000e+00> : vector<16x32xf32>
    %390 = tpu.matmul %378, %386, %cst_128 {dimension_numbers = #tpu.dot_dimension_numbers<[1], [1], [0], [0], [0, 0, 1, 0], [], []>} : vector<16x32xf32>, vector<32x32xf32>, vector<16x32xf32> -> vector<16x32xf32>
    %cst_129 = arith.constant 0.176776692 : f32
    %391 = vector.broadcast %cst_129 : f32 to vector<16x32xf32>
    %392 = arith.mulf %390, %391 : vector<16x32xf32>
    %cst_130 = arith.constant dense<0xFF800000> : vector<16xf32>
    %393 = vector.multi_reduction <maximumf>, %392, %cst_130 [1] : vector<16x32xf32> to vector<16xf32>
    %394 = vector.shape_cast %393 : vector<16xf32> to vector<16x1xf32>
    %395 = vector.broadcast %394 : vector<16x1xf32> to vector<16x32xf32>
    %396 = arith.subf %392, %395 : vector<16x32xf32>
    %397 = math.exp %396 : vector<16x32xf32>
    %cst_131 = arith.constant dense<0.000000e+00> : vector<16x32xf32>
    %398 = tpu.matmul %397, %129, %cst_131 {dimension_numbers = #tpu.dot_dimension_numbers<[1], [0], [0], [1], [0, 0, 1, 1], [], []>} : vector<16x32xf32>, vector<32x32xf32>, vector<16x32xf32> -> vector<16x32xf32>
    %399 = tpu.reciprocal %398 {approx = true} : vector<16x32xf32> -> vector<16x32xf32>
    %400 = arith.mulf %397, %399 : vector<16x32xf32>
    %cst_132 = arith.constant dense<0.000000e+00> : vector<16x32xf32>
    %401 = tpu.matmul %400, %389, %cst_132 {dimension_numbers = #tpu.dot_dimension_numbers<[1], [0], [0], [1], [0, 0, 1, 1], [], []>} : vector<16x32xf32>, vector<32x32xf32>, vector<16x32xf32> -> vector<16x32xf32>
    %402 = arith.addf %378, %401 : vector<16x32xf32>
    %cst_133 = arith.constant dense<0.000000e+00> : vector<16x32xf32>
    %403 = tpu.matmul %402, %8, %cst_133 {dimension_numbers = #tpu.dot_dimension_numbers<[1], [0], [0], [1], [0, 0, 1, 1], [], []>} : vector<16x32xf32>, vector<32x32xf32>, vector<16x32xf32> -> vector<16x32xf32>
    %404 = vector.broadcast %9 : vector<1x32xf32> to vector<16x32xf32>
    %405 = arith.addf %403, %404 : vector<16x32xf32>
    %cst_134 = arith.constant 5.000000e-01 : f32
    %406 = vector.broadcast %cst_134 : f32 to vector<16x32xf32>
    %407 = arith.mulf %406, %405 : vector<16x32xf32>
    %cst_135 = arith.constant 0.707106769 : f32
    %408 = vector.broadcast %cst_135 : f32 to vector<16x32xf32>
    %409 = arith.mulf %405, %408 : vector<16x32xf32>
    %410 = math.absf %409 : vector<16x32xf32>
    %cst_136 = arith.constant 0.327591091 : f32
    %411 = vector.broadcast %cst_136 : f32 to vector<16x32xf32>
    %412 = arith.mulf %411, %410 : vector<16x32xf32>
    %cst_137 = arith.constant 1.000000e+00 : f32
    %413 = vector.broadcast %cst_137 : f32 to vector<16x32xf32>
    %414 = arith.addf %413, %412 : vector<16x32xf32>
    %cst_138 = arith.constant 1.000000e+00 : f32
    %415 = vector.broadcast %cst_138 : f32 to vector<16x32xf32>
    %416 = arith.divf %415, %414 : vector<16x32xf32>
    %cst_139 = arith.constant 1.06140542 : f32
    %417 = vector.broadcast %cst_139 : f32 to vector<16x32xf32>
    %418 = arith.mulf %417, %416 : vector<16x32xf32>
    %cst_140 = arith.constant -1.45315206 : f32
    %419 = vector.broadcast %cst_140 : f32 to vector<16x32xf32>
    %420 = arith.addf %418, %419 : vector<16x32xf32>
    %421 = arith.mulf %420, %416 : vector<16x32xf32>
    %cst_141 = arith.constant 1.42141378 : f32
    %422 = vector.broadcast %cst_141 : f32 to vector<16x32xf32>
    %423 = arith.addf %421, %422 : vector<16x32xf32>
    %424 = arith.mulf %423, %416 : vector<16x32xf32>
    %cst_142 = arith.constant -0.284496725 : f32
    %425 = vector.broadcast %cst_142 : f32 to vector<16x32xf32>
    %426 = arith.addf %424, %425 : vector<16x32xf32>
    %427 = arith.mulf %426, %416 : vector<16x32xf32>
    %cst_143 = arith.constant 0.254829586 : f32
    %428 = vector.broadcast %cst_143 : f32 to vector<16x32xf32>
    %429 = arith.addf %427, %428 : vector<16x32xf32>
    %430 = arith.mulf %429, %416 : vector<16x32xf32>
    %431 = arith.mulf %410, %410 : vector<16x32xf32>
    %cst_144 = arith.constant 0.000000e+00 : f32
    %432 = vector.broadcast %cst_144 : f32 to vector<16x32xf32>
    %433 = arith.subf %432, %431 : vector<16x32xf32>
    %434 = math.exp %433 : vector<16x32xf32>
    %435 = arith.mulf %430, %434 : vector<16x32xf32>
    %cst_145 = arith.constant 1.000000e+00 : f32
    %436 = vector.broadcast %cst_145 : f32 to vector<16x32xf32>
    %437 = arith.subf %436, %435 : vector<16x32xf32>
    %cst_146 = arith.constant 0.000000e+00 : f32
    %438 = vector.broadcast %cst_146 : f32 to vector<16x32xf32>
    %439 = arith.cmpf oge, %409, %438 : vector<16x32xf32>
    %cst_147 = arith.constant 0.000000e+00 : f32
    %440 = vector.broadcast %cst_147 : f32 to vector<16x32xf32>
    %441 = arith.subf %440, %437 : vector<16x32xf32>
    %442 = arith.select %439, %437, %441 : vector<16x32xi1>, vector<16x32xf32>
    %cst_148 = arith.constant 1.000000e+00 : f32
    %443 = vector.broadcast %cst_148 : f32 to vector<16x32xf32>
    %444 = arith.addf %443, %442 : vector<16x32xf32>
    %445 = arith.mulf %407, %444 : vector<16x32xf32>
    %446 = arith.addf %402, %445 : vector<16x32xf32>
    %c1_149 = arith.constant 1 : index
    %c0_150 = arith.constant 0 : index
    %c0_151 = arith.constant 0 : index
    %447 = vector.load %arg4[%c1_149, %c0_150, %c0_151] : memref<2x16x32xf32, #tpu.memory_space<vmem>>, vector<1x16x32xf32>
    %448 = vector.shape_cast %447 : vector<1x16x32xf32> to vector<16x32xf32>
    %449 = vector.shape_cast %446 : vector<16x32xf32> to vector<1x16x32xf32>
    tpu.vector_store %arg4[%c1_149, %c0_150, %c0_151], %449 {strides = array<i32>} : memref<2x16x32xf32, #tpu.memory_space<vmem>>, vector<1x16x32xf32>,
    return
  }
  func.func @transform_0(%arg0: i32) -> (i32, i32, i32) {
    %c0_i32 = arith.constant 0 : i32
    %c0_i32_0 = arith.constant 0 : i32
    %c0_i32_1 = arith.constant 0 : i32
    return %arg0, %c0_i32, %c0_i32_0 : i32, i32, i32
  }
  func.func @transform_1(%arg0: i32) -> (i32, i32, i32) {
    %c0_i32 = arith.constant 0 : i32
    %c0_i32_0 = arith.constant 0 : i32
    %c0_i32_1 = arith.constant 0 : i32
    return %arg0, %c0_i32, %c0_i32_0 : i32, i32, i32
  }
  func.func @transform_2(%arg0: i32) -> (i32, i32) {
    %c0_i32 = arith.constant 0 : i32
    %c0_i32_0 = arith.constant 0 : i32
    %c0_i32_1 = arith.constant 0 : i32
    return %c0_i32, %c0_i32_0 : i32, i32
  }
  func.func @transform_3(%arg0: i32) -> (i32, i32, i32) {
    %c0_i32 = arith.constant 0 : i32
    %c0_i32_0 = arith.constant 0 : i32
    %c0_i32_1 = arith.constant 0 : i32
    return %arg0, %c0_i32, %c0_i32_0 : i32, i32, i32
  }
}

</mosaic_0001>

<bundles_post_ra>
// kernel: fpssab_forward.1
= control target key start
LH: loop header
LB: loop body
LE: loop exit
PB: predicated region body
PF: predicated region fallthrough
CT: control target
= control target key end

     0   :  { %vm200_vm0 = vcmask 64512   ;;  %v1555_v2 = vmov 0   ;;  %s2091_s0 = inlined_call_operand.vmem [shape: f32[2,16,8], index: 0, kind: input, shape index: {}]   ;;  %s2092_s1 = inlined_call_operand.vmem [shape: s32[2,8,1], index: 1, kind: input, shape index: {}]   ;;  %s2093_s2 = inlined_call_operand.vmem [shape: f32[120,96], index: 2, kind: input, shape index: {}]   ;;  %s2094_s3 = inlined_call_operand.hbm [shape: f32[2,16,32], index: 3, kind: output, shape index: {}]  }
   0x1   :  { %v1586_v0 = vld [vmem:[%s2093_s2] sm:$0xff]  ;;  %1474 = vset.pattern.permute.xlu0 %v1555_v2  ;;  %1475 = vset.pattern.permute.xlu1 %v1555_v2 }
   0x2   :  { %v1591_v1 = vld [vmem:[%s2091_s0] sm:$0xff]  ;;  %222 = vmatpush.msra.mxu0 %v1586_v0 }
   0x3   :  { %v193_v3 = vld [vmem:[%s2092_s1] sm:$0xff]  ;;  %1354 = vmatmul.msk.f32.vlgmr.msra.gmra.mxu0 %vm200_vm0, %v1591_v1 }
   0x4   :  { %195 = vperm.xlu0 %1474, %v193_v3  }
   0x5   :  { %8 = vsyncpa [#allocation3], 0  ;;  %v1604_v4 = vld [vmem:[%s2091_s0 + $0x8] sm:$0xff]  ;;  %v1611_v5 = vld [vmem:[%s2093_s2 + $0x70] ss:$0 sm:$0xff]  ;;  %v43_v6 = vlaneseq  ;;  %s1556_s22 = smov 96  }
   0x6   :  { %v1557_v13 = vmov 0.0   ;;  %vm231_vm2 = vcmask 130048   ;;  %s1558_s23 = smov 64   ;;  %vm287_vm10 = vcmask 261120   ;;  %v1559_v38 = vmov 1.0   ;;  %v1717_v46 = vld [vmem:[%s2093_s2 + $0x48] sm:$0xff] }
   0x7   :  { %v1614_v9 = vand.u32 127, %v43_v6  ;;  %vm336_vm14 = vcmask 523264   ;;  %v1722_v47 = vld [vmem:[%s2093_s2 + $0x40] sm:$0xff]  ;;  %v1730_v51 = vld [vmem:[%s2093_s2 + $0x38] sm:$0xff]  ;;  %v1736_v52 = vld [vmem:[%s2093_s2 + $0x30] sm:$0xff]  ;;  %s1309_s11 = sshll.u32 %s2094_s3, 4  ;;  %s1310_s11 = int_to_ptr.hbm [resolvable:$true] %s1309_s11 }
   0x8   :  { %v1746_v55 = vld [vmem:[%s2093_s2 + $0x73] ss:$0 sm:$0xff]  ;;  %v1752_v3 = vld [vmem:[%s2093_s2 + $0x28] sm:$0xff]  ;;  %s1561_s12 = smov 128   ;;  %s1562_s13 = smov 8  }
   0x9   :  { %vm61_vm3 = vcmp.ge.s32.totalorder %v1614_v9, 8  ;;  %vm87_vm4 = vcmp.ge.s32.totalorder %v1614_v9, 16  ;;  %vm114_vm5 = vcmp.ge.s32.totalorder %v1614_v9, 24  ;;  %vm125_vm11 = vcmp.ge.s32.totalorder %v1614_v9, 32 }
   0xa   :  { %v62_v15 = vsel %vm61_vm3, 1, %v1555_v2  ;;  %v88_v16 = vsel %vm87_vm4, 1, %v1555_v2  ;;  %v115_v18 = vsel %vm114_vm5, 1, %v1555_v2  ;;  %vm128_vm12 = vcmp.ge.s32.totalorder %v1614_v9, 48 }
   0xb   :  { %1355 = vmatmul.msk.f32.gmra.mxu0 %vm200_vm0, %v1604_v4  ;;  %v89_v17 = vadd.s32 %v88_v16, %v62_v15  ;;  %v126_v34 = vsel %vm125_vm11, 1, %v1555_v2  ;;  %v129_v35 = vsel %vm128_vm12, 1, %v1555_v2  ;;  %v1770_v15 = vld [vmem:[%s2093_s2 + $0x10] sm:$0xff] }
   0xc   :  { %v127_v36 = vadd.s32 %v126_v34, %v88_v16 }
   0xd   :  { %v1630_v19 = vadd.s32 %v115_v18, %v89_v17 }
   0xe   :  { %v1682_v37 = vadd.s32 %v129_v35, %v127_v36 }
   0xf   :  { %vm1327_vm6 = vcmp.eq.s32.totalorder %v1630_v19, 3  ;;  %vm1325_vm7 = vcmp.eq.s32.totalorder %v1630_v19, 2  ;;  %vm1323_vm8 = vcmp.eq.s32.totalorder %v1630_v19, 1  ;;  %vm1321_vm9 = vcmp.eq.s32.totalorder %v1630_v19, 0 }
  0x10   :  { %vm1335_vm13 = vcmp.eq.s32.totalorder %v1682_v37, 3  ;;  %vm1333_vm15 = vcmp.eq.s32.totalorder %v1682_v37, 2  ;;  %vm1329_vm3 = vcmp.eq.s32.totalorder %v1682_v37, 0 }
  0x11   :  { %1366 = vmatpush.msk.msra.mxu3 %vm1335_vm13, %v1559_v38 }
  0x13   :  { %1367 = vmatpush.msk.msra.mxu3 %vm1335_vm13, %v1559_v38 }
  0x15   :  { %1368 = vmatpush.msk.msra.mxu3 %vm1333_vm15, %v1559_v38 }
  0x17   :  { %1369 = vmatpush.msk.msra.mxu3 %vm1333_vm15, %v1559_v38 }
  0x76   :  { %v196_v10 = vpop.permute.xlu0 %195 }
  0x77   :  { %vm197_vm1 = vcmp.eq.s32.totalorder %v1614_v9, %v196_v10  ;;  %v1758_v10 = vld [vmem:[%s2093_s2 + $0x20] sm:$0xff] }
  0x78   :  { %v1353_v14 = vsel %vm197_vm1, 1.0, %v1557_v13  ;;  %vm1331_vm1 = vcmp.eq.s32.totalorder %v1682_v37, 1 }
  0x79   :  { %1370 = vmatpush.msk.msra.mxu3 %vm1331_vm1, %v1559_v38 }
  0x7b   :  { %1371 = vmatpush.msk.msra.mxu3 %vm1331_vm1, %v1559_v38 }
  0x7d   :  { %1372 = vmatpush.msk.msra.mxu3 %vm1329_vm3, %v1559_v38 }
  0x7f   :  { %1373 = vmatpush.msk.msra.mxu3 %vm1329_vm3, %v1559_v38 }
  0x80   :  { %v224_v7 = vpop.f32.mrf.mxu0 }
  0x81   :  { %v255_v8 = vadd.f32 %v1611_v5, %v224_v7  ;;  %497 = vmatpush.msrb.mxu3 %v1752_v3 }
  0x83   :  { %259 = vrot.lane.b32.xlu1 %v255_v8, %s1556_s22  ;;  %498 = vmatpush.msrb.mxu3 %v1758_v10 }
  0x88   :  { %v227_v11 = vpop.f32.mrf.mxu0 }
  0x89   :  { %249 = vmatpush.msra.mxu1 %v227_v11  ;;  %v256_v12 = vadd.f32 %v1611_v5, %v227_v11 }
  0x8b   :  { %275 = vrot.lane.b32.xlu2 %v256_v12, %s1558_s23  ;;  %261 = vrot.lane.b32.xlu0 %v256_v12, %s1556_s22  ;;  %v1764_v12 = vld [vmem:[%s2093_s2 + $0x18] sm:$0xff] }
  0x8c   :  { %250 = vmatpush.msra.mxu1 %v224_v7  ;;  %499 = vmatpush.msrb.mxu3 %v1764_v12 }
  0x8d   :  { %1356 = vmatmul.msk.f32.vlgmr.msra.gmra.mxu1 %vm231_vm2, %v1353_v14 }
  0x8e   :  { %408 = vmatpush.msrb.mxu1 %v1717_v46  ;;  %500 = vmatpush.msrb.mxu3 %v1770_v15 }
  0x90   :  { %409 = vmatpush.msrb.mxu1 %v1722_v47 }
  0x92   :  { %410 = vmatpush.msrb.mxu1 %v1730_v51 }
  0x93   :  { %273 = vrot.lane.b32.xlu2 %v255_v8, %s1558_s23 }
  0x94   :  { %411 = vmatpush.msrb.mxu1 %v1736_v52 }
  0xe5   :  { %v276_v20 = vpop.permute.xlu2 %275 }
  0xe6   :  { %1375 = vmatpush.msk.msrb.mxu0 %vm1327_vm6, %v276_v20 }
  0xed   :  { %v274_v21 = vpop.permute.xlu2 %273 }
  0xee   :  { %1376 = vmatpush.msk.msrb.mxu0 %vm1327_vm6, %v274_v21 }
  0xf0   :  { %1377 = vmatpush.msk.msrb.mxu0 %vm1325_vm7, %v276_v20 }
  0xf2   :  { %1378 = vmatpush.msk.msrb.mxu0 %vm1325_vm7, %v274_v21 }
  0xf4   :  { %1379 = vmatpush.msk.msrb.mxu0 %vm1323_vm8, %v276_v20 }
  0xf5   :  { %v260_v24 = vpop.permute.xlu1 %259 }
  0xf6   :  { %1380 = vmatpush.msk.msrb.mxu0 %vm1323_vm8, %v274_v21  ;;  %v271_v25 = vsel %vm1327_vm6, %v260_v24, 0.0  ;;  %v269_v27 = vsel %vm1325_vm7, %v260_v24, 0.0  ;;  %v267_v29 = vsel %vm1323_vm8, %v260_v24, 0.0  ;;  %v265_v33 = vsel %vm1321_vm9, %v260_v24, 0.0 }
  0xf8   :  { %1381 = vmatpush.msk.msrb.mxu0 %vm1321_vm9, %v276_v20  ;;  %v1776_v20 = vld [vmem:[%s2093_s2 + $0x8] sm:$0xff] }
  0xf9   :  { %473 = vmatpush.msra.mxu1 %v1776_v20 }
  0xfa   :  { %1382 = vmatpush.msk.msrb.mxu0 %vm1321_vm9, %v274_v21  ;;  %v1410_v21 = vld [vmem:[%s2092_s1 + $0x8] sm:$0xff] }
  0xfd   :  { %v262_v22 = vpop.permute.xlu0 %261 }
  0xfe   :  { %v272_v23 = vsel %vm1327_vm6, %v262_v22, 0.0  ;;  %v270_v26 = vsel %vm1325_vm7, %v262_v22, 0.0  ;;  %v268_v28 = vsel %vm1323_vm8, %v262_v22, 0.0  ;;  %v266_v30 = vsel %vm1321_vm9, %v262_v22, 0.0 }
  0xff   :  { %1357 = vmatpush.xpose.msk.msra.mxu2 %vm287_vm10, %v272_v23 }
 0x103   :  { %1358 = vmatpush.xpose.msk.msra.mxu2 %vm287_vm10, %v271_v25 }
 0x107   :  { %1359 = vmatpush.xpose.msk.msra.mxu2 %vm287_vm10, %v270_v26 }
 0x10a   :  { %v252_v31 = vpop.f32.mrf.mxu1 }
 0x10b   :  { %1360 = vmatpush.xpose.msk.msra.mxu2 %vm287_vm10, %v269_v27  ;;  %v253_v32 = vadd.f32 %v1611_v5, %v252_v31 }
 0x10f   :  { %1361 = vmatpush.xpose.msk.msra.mxu2 %vm287_vm10, %v268_v28 }
 0x113   :  { %1362 = vmatpush.xpose.msk.msra.mxu2 %vm287_vm10, %v267_v29 }
 0x117   :  { %1363 = vmatpush.xpose.msk.msra.mxu2 %vm287_vm10, %v266_v30 }
 0x11b   :  { %1364 = vmatpush.xpose.msk.msra.mxu2 %vm287_vm10, %v265_v33 }
 0x11e   :  { %1365 = vmatmul.msk.f32.vlgmr.msra.gmra.mxu2 %vm287_vm10, %v253_v32 }
 0x1a1   :  { %v332_v39 = vpop.f32.mrf.mxu2 }
 0x1a2   :  { %v335_v40 = vmul.f32 0.17677669, %v332_v39 }
 0x1a4   :  { %v337_v41 = vsel %vm336_vm14, %v335_v40, -inf }
 0x1a5   :  { %338 = vmax.xlane.f32.xlu1 %v337_v41 }
 0x1be   :  { %756 = vperm.xlu1 %1475, %v1410_v21  }
 0x218   :  { %v339_v42 = vpop.xlane.xlu1 %338 }
 0x219   :  { %v340_v43 = vsub.f32 %v335_v40, %v339_v42 }
 0x21b   :  { %v341_v44 = vmul.f32 1.442695, %v340_v43 }
 0x21d   :  { %1481 = vpow2.f32 %v341_v44 }
 0x223   :  { %v1482_v45 = vpop.eup %1481 }
 0x224   :  { %1374 = vmatmul.msk.f32.vlgmr.msra.gmra.mxu3 %vm336_vm14, %v1482_v45 }
 0x225   :  { %1394 = vmatpush.msk.msra.mxu3 %vm1327_vm6, %v1559_v38 }
 0x227   :  { %1395 = vmatpush.msk.msra.mxu3 %vm1325_vm7, %v1559_v38 }
 0x229   :  { %1396 = vmatpush.msk.msra.mxu3 %vm1323_vm8, %v1559_v38 }
 0x22b   :  { %1397 = vmatpush.msk.msra.mxu3 %vm1321_vm9, %v1559_v38 }
 0x2a7   :  { %v363_v48 = vpop.f32.mrf.mxu3 }
 0x2a8   :  { %1483 = vrcp.f32 %v363_v48 }
 0x2ae   :  { %v1484_v49 = vpop.eup %1483 }
 0x2af   :  { %v367_v50 = vmul.f32 %v1484_v49, %v1482_v45 }
 0x2b1   :  { %1383 = vmatmul.msk.f32.vlgmr.msrb.gmra.mxu0 %vm336_vm14, %v367_v50  ;;  %v1819_v50 = vld [vmem:[%s2093_s2 + $0x71] ss:$0 sm:$0xff] }
 0x32e   :  { %v388_v53 = vpop.f32.mrf.mxu0 }
 0x32f   :  { %v1739_v54 = vadd.f32 %v388_v53, %v253_v32 }
 0x331   :  { %1384 = vmatmul.msk.f32.vlgmr.msrb.gmra.mxu1 %vm287_vm10, %v1739_v54 }
 0x339   :  { %1385 = vmatmul.msk.f32.vlgmr.msra.gmra.mxu1 %vm200_vm0, %v1591_v1 }
 0x341   :  { %1386 = vmatmul.msk.f32.gmra.mxu1 %vm200_vm0, %v1604_v4  ;;  %v1804_v4 = vld [vmem:[%s2093_s2 + $0x72] ss:$0 sm:$0xff] }
 0x3ae   :  { %v413_v56 = vpop.f32.mrf.mxu1 }
 0x3af   :  { %v414_v57 = vadd.f32 %v1746_v55, %v413_v56 }
 0x3b1   :  { %v417_v58 = vmul.f32 0.70710677, %v414_v57  ;;  %v416_v39 = vmul.f32 0.5, %v414_v57 }
 0x3b3   :  { %v418_v59 = vand.u32 2147483647, %v417_v58 }
 0x3b5   :  { %v419_v60 = vmul.f32 0.3275911, %v418_v59  ;;  %v445_v18 = vmul.f32 %v418_v59, %v418_v59 }
 0x3b7   :  { %v420_v61 = vadd.f32 1.0, %v419_v60  ;;  %v446_v24 = vsub.f32 0.0, %v445_v18 }
 0x3b9   :  { %1485 = vrcp.f32 %v420_v61  ;;  %v432_v6 = vand.u32 2147483648, %v420_v61  ;;  %v430_v8 = vand.u32 2147483647, %v420_v61  ;;  %vm426_vm5 = vweird.f32 %v420_v61 }
 0x3ba   :  { %v447_v27 = vmul.f32 1.442695, %v446_v24 }
 0x3bb   :  { %v433_v14 = vor.u32 1.1754944e-38, %v432_v6  ;;  %vm431_vm12 = vcmp.eq.f32.partialorder %v430_v8, 8.507059e+37 }
 0x3bc   :  { %1487 = vpow2.f32 %v447_v27 }
 0x3bf   :  { %v1486_v62 = vpop.eup %1485 }
 0x3c0   :  { %v422_v63 = vmul.f32 %v1486_v62, %v420_v61  ;;  %vm427_vm4 = vweird.f32 %v1486_v62 }
 0x3c1   :  { %vm428_vm11 = vmor %vm426_vm5, %vm427_vm4  ;;  %vm451_vm4 = vcmp.ge.f32.partialorder %v417_v58, 0.0  ;;  %v757_v58 = vpop.permute.xlu1 %756 }
 0x3c2   :  { %v423_v2 = vsub.f32 1.0, %v422_v63  ;;  %v1488_v32 = vpop.eup %1487  ;;  %vm758_vm5 = vcmp.eq.s32.totalorder %v1614_v9, %v757_v58  ;;  %v32_v9 = vld [vmem:[%s2093_s2 + $0x68] sm:$0xff] }
 0x3c3   :  { %655 = vmatpush.msrb.mxu2 %v32_v9 }
 0x3c4   :  { %v424_v7 = vmul.f32 %v1486_v62, %v423_v2 }
 0x3c6   :  { %v425_v11 = vadd.f32 %v1486_v62, %v424_v7 }
 0x3c8   :  { %v429_v16 = vsel %vm428_vm11, %v1486_v62, %v425_v11 }
 0x3c9   :  { %v434_v17 = vsel %vm431_vm12, %v433_v14, %v429_v16 }
 0x3ca   :  { %v436_v22 = vmul.f32 1.0614054, %v434_v17 }
 0x3cc   :  { %v437_v23 = vadd.f32 -1.4531521, %v436_v22  ;;  %v1850_v22 = vld [vmem:[%s2091_s0 + $0x10] sm:$0xff] }
 0x3ce   :  { %v438_v25 = vmul.f32 %v437_v23, %v434_v17  ;;  %v1857_v23 = vld [vmem:[%s2091_s0 + $0x18] sm:$0xff] }
 0x3d0   :  { %v439_v26 = vadd.f32 1.4214138, %v438_v25 }
 0x3d2   :  { %v440_v1 = vmul.f32 %v439_v26, %v434_v17 }
 0x3d4   :  { %v441_v28 = vadd.f32 -0.28449672, %v440_v1 }
 0x3d6   :  { %v442_v29 = vmul.f32 %v441_v28, %v434_v17 }
 0x3d8   :  { %v443_v30 = vadd.f32 0.2548296, %v442_v29 }
 0x3da   :  { %v444_v31 = vmul.f32 %v443_v30, %v434_v17 }
 0x3dc   :  { %v449_v33 = vmul.f32 %v1488_v32, %v444_v31  ;;  %v1411_v32 = vsel %vm758_vm5, 1.0, %v1557_v13  ;;  %v31_v13 = vld [vmem:[%s2093_s2 + $0x60] sm:$0xff] }
 0x3dd   :  { %656 = vmatpush.msrb.mxu2 %v31_v13 }
 0x3de   :  { %v450_v34 = vsub.f32 1.0, %v449_v33 }
 0x3e0   :  { %v452_v35 = vsub.f32 0.0, %v450_v34 }
 0x3e2   :  { %v453_v36 = vsel %vm451_vm4, %v450_v34, %v452_v35 }
 0x3e3   :  { %v454_v40 = vadd.f32 1.0, %v453_v36 }
 0x3e5   :  { %v455_v41 = vmul.f32 %v454_v40, %v416_v39 }
 0x3e7   :  { %v456_v42 = vadd.f32 %v455_v41, %v1739_v54 }
 0x3e9   :  { %1387 = vmatmul.msk.f32.vlgmr.msrb.gmra.mxu3 %vm287_vm10, %v456_v42 }
 0x3ea   :  { %782 = vmatpush.msrb.mxu3 %v1586_v0  ;;  %v475_v0 = vpop.f32.mrf.mxu1 }
 0x3eb   :  { %v1823_v53 = vadd.f32 %v1819_v50, %v475_v0 }
 0x3f2   :  { %v478_v56 = vpop.f32.mrf.mxu1 }
 0x3f3   :  { %v1831_v57 = vadd.f32 %v1819_v50, %v478_v56 }
 0x46c   :  { %v502_v43 = vpop.f32.mrf.mxu3 }
 0x46d   :  { %v503_v44 = vadd.f32 %v1804_v4, %v502_v43 }
 0x46f   :  { %510 = vrot.lane.b32.xlu1 %v503_v44, %s1556_s22  ;;  %v508_v45 = vsel %vm1327_vm6, %v503_v44, 0.0  ;;  %v507_v48 = vsel %vm1325_vm7, %v503_v44, 0.0  ;;  %v506_v49 = vsel %vm1323_vm8, %v503_v44, 0.0  ;;  %v505_v54 = vsel %vm1321_vm9, %v503_v44, 0.0 }
 0x470   :  { %1388 = vmatpush.xpose.msk.msra.mxu0 %vm287_vm10, %v508_v45 }
 0x474   :  { %1389 = vmatpush.xpose.msk.msra.mxu0 %vm287_vm10, %v507_v48 }
 0x478   :  { %1390 = vmatpush.xpose.msk.msra.mxu0 %vm287_vm10, %v506_v49 }
 0x47c   :  { %1391 = vmatpush.xpose.msk.msra.mxu0 %vm287_vm10, %v505_v54 }
 0x47f   :  { %1392 = vmatmul.msk.f32.vlgmr.msra.gmra.mxu0 %vm287_vm10, %v1823_v53 }
 0x487   :  { %1393 = vmatmul.msk.f32.gmra.mxu0 %vm287_vm10, %v1831_v57 }
 0x4e1   :  { %v511_v59 = vpop.permute.xlu1 %510 }
 0x4e2   :  { %1400 = vmatpush.msk.msrb.mxu1 %vm1327_vm6, %v511_v59 }
 0x4e4   :  { %1401 = vmatpush.msk.msrb.mxu1 %vm1325_vm7, %v511_v59 }
 0x4e6   :  { %1402 = vmatpush.msk.msrb.mxu1 %vm1323_vm8, %v511_v59 }
 0x4e8   :  { %1403 = vmatpush.msk.msrb.mxu1 %vm1321_vm9, %v511_v59 }
 0x4fc   :  { %v552_v60 = vpop.f32.mrf.mxu0 }
 0x4fd   :  { %v558_v61 = vmul.f32 0.17677669, %v552_v60 }
 0x4ff   :  { %v560_v62 = vsel %vm287_vm10, %v558_v61, -inf }
 0x500   :  { %561 = vmax.xlane.f32.xlu0 %v560_v62 }
 0x504   :  { %v555_v63 = vpop.f32.mrf.mxu0 }
 0x505   :  { %v559_v2 = vmul.f32 0.17677669, %v555_v63 }
 0x507   :  { %v563_v6 = vsel %vm287_vm10, %v559_v2, -inf }
 0x508   :  { %564 = vmax.xlane.f32.xlu2 %v563_v6 }
 0x573   :  { %v562_v7 = vpop.xlane.xlu0 %561 }
 0x574   :  { %v566_v8 = vsub.f32 %v558_v61, %v562_v7 }
 0x576   :  { %v568_v11 = vmul.f32 1.442695, %v566_v8 }
 0x578   :  { %1489 = vpow2.f32 %v568_v11 }
 0x57b   :  { %v565_v14 = vpop.xlane.xlu2 %564 }
 0x57c   :  { %v567_v16 = vsub.f32 %v559_v2, %v565_v14 }
 0x57e   :  { %v1490_v17 = vpop.eup %1489  ;;  %v570_v18 = vmul.f32 1.442695, %v567_v16 }
 0x57f   :  { %1398 = vmatmul.msk.f32.vlgmr.msra.gmra.mxu3 %vm287_vm10, %v1490_v17 }
 0x580   :  { %1491 = vpow2.f32 %v570_v18 }
 0x586   :  { %v1492_v21 = vpop.eup %1491 }
 0x587   :  { %1399 = vmatmul.msk.f32.gmra.mxu3 %vm287_vm10, %v1492_v21 }
 0x58f   :  { %1412 = vmatmul.msk.f32.vlgmr.msrb.gmra.mxu3 %vm200_vm0, %v1850_v22 }
 0x597   :  { %1413 = vmatmul.msk.f32.gmra.mxu3 %vm200_vm0, %v1857_v23 }
 0x602   :  { %v595_v24 = vpop.f32.mrf.mxu3 }
 0x603   :  { %1493 = vrcp.f32 %v595_v24 }
 0x609   :  { %v1494_v25 = vpop.eup %1493 }
 0x60a   :  { %v603_v26 = vmul.f32 %v1494_v25, %v1490_v17  ;;  %v598_v27 = vpop.f32.mrf.mxu3 }
 0x60b   :  { %1495 = vrcp.f32 %v598_v27 }
 0x60c   :  { %1404 = vmatmul.msk.f32.vlgmr.msrb.gmra.mxu1 %vm287_vm10, %v603_v26 }
 0x611   :  { %v1496_v1 = vpop.eup %1495 }
 0x612   :  { %v784_v28 = vpop.f32.mrf.mxu3  ;;  %v604_v29 = vmul.f32 %v1496_v1, %v1492_v21 }
 0x613   :  { %v813_v30 = vadd.f32 %v1611_v5, %v784_v28 }
 0x614   :  { %1405 = vmatmul.msk.f32.gmra.mxu1 %vm287_vm10, %v604_v29 }
 0x615   :  { %831 = vrot.lane.b32.xlu1 %v813_v30, %s1558_s23  ;;  %817 = vrot.lane.b32.xlu0 %v813_v30, %s1556_s22 }
 0x61a   :  { %v787_v31 = vpop.f32.mrf.mxu3 }
 0x61b   :  { %v814_v33 = vadd.f32 %v1611_v5, %v787_v31  ;;  %807 = vmatpush.msrb.mxu0 %v787_v31 }
 0x61d   :  { %819 = vrot.lane.b32.xlu2 %v814_v33, %s1556_s22  ;;  %808 = vmatpush.msrb.mxu0 %v784_v28 }
 0x61e   :  { %1414 = vmatmul.msk.f32.vlgmr.msrb.gmra.mxu0 %vm231_vm2, %v1411_v32 }
 0x61f   :  { %963 = vmatpush.msra.mxu0 %v1717_v46  ;;  %v30_v46 = vld [vmem:[%s2093_s2 + $0x58] sm:$0xff] }
 0x620   :  { %657 = vmatpush.msrb.mxu2 %v30_v46 }
 0x621   :  { %964 = vmatpush.msra.mxu0 %v1722_v47  ;;  %v29_v47 = vld [vmem:[%s2093_s2 + $0x50] sm:$0xff] }
 0x622   :  { %658 = vmatpush.msrb.mxu2 %v29_v47 }
 0x623   :  { %965 = vmatpush.msra.mxu0 %v1730_v51 }
 0x624   :  { %1424 = vmatpush.msk.msra.mxu2 %vm1335_vm13, %v1559_v38 }
 0x625   :  { %833 = vrot.lane.b32.xlu2 %v814_v33, %s1558_s23  ;;  %966 = vmatpush.msra.mxu0 %v1736_v52 }
 0x626   :  { %1425 = vmatpush.msk.msra.mxu2 %vm1335_vm13, %v1559_v38 }
 0x627   :  { %1050 = vmatpush.msrb.mxu0 %v1752_v3 }
 0x628   :  { %1426 = vmatpush.msk.msra.mxu2 %vm1333_vm15, %v1559_v38 }
 0x629   :  { %1051 = vmatpush.msrb.mxu0 %v1758_v10 }
 0x62a   :  { %1427 = vmatpush.msk.msra.mxu2 %vm1333_vm15, %v1559_v38 }
 0x62b   :  { %1052 = vmatpush.msrb.mxu0 %v1764_v12 }
 0x62c   :  { %1428 = vmatpush.msk.msra.mxu2 %vm1331_vm1, %v1559_v38 }
 0x62d   :  { %1053 = vmatpush.msrb.mxu0 %v1770_v15 }
 0x62e   :  { %1429 = vmatpush.msk.msra.mxu2 %vm1331_vm1, %v1559_v38 }
 0x630   :  { %1430 = vmatpush.msk.msra.mxu2 %vm1329_vm3, %v1559_v38 }
 0x632   :  { %1431 = vmatpush.msk.msra.mxu2 %vm1329_vm3, %v1559_v38 }
 0x677   :  { %v820_v51 = vpop.permute.xlu2 %819 }
 0x678   :  { %v830_v52 = vsel %vm1327_vm6, %v820_v51, 0.0  ;;  %v828_v37 = vsel %vm1325_vm7, %v820_v51, 0.0  ;;  %v824_v42 = vsel %vm1321_vm9, %v820_v51, 0.0 }
 0x679   :  { %1415 = vmatpush.xpose.msk.msra.mxu1 %vm287_vm10, %v830_v52 }
 0x67f   :  { %v834_v3 = vpop.permute.xlu2 %833 }
 0x680   :  { %1433 = vmatpush.msk.msra.mxu3 %vm1327_vm6, %v834_v3 }
 0x687   :  { %v818_v10 = vpop.permute.xlu0 %817  ;;  %v832_v12 = vpop.permute.xlu1 %831 }
 0x688   :  { %1434 = vmatpush.msk.msra.mxu3 %vm1327_vm6, %v832_v12  ;;  %v829_v15 = vsel %vm1327_vm6, %v818_v10, 0.0  ;;  %v827_v36 = vsel %vm1325_vm7, %v818_v10, 0.0  ;;  %v825_v41 = vsel %vm1323_vm8, %v818_v10, 0.0  ;;  %v823_v45 = vsel %vm1321_vm9, %v818_v10, 0.0 }
 0x689   :  { %v628_v34 = vpop.f32.mrf.mxu1  ;;  %1416 = vmatpush.xpose.msk.msra.mxu1 %vm287_vm10, %v829_v15 }
 0x68a   :  { %v1927_v35 = vadd.f32 %v628_v34, %v1823_v53  ;;  %1435 = vmatpush.msk.msra.mxu3 %vm1325_vm7, %v834_v3 }
 0x68c   :  { %1406 = vmatmul.msk.f32.vlgmr.msrb.gmra.mxu2 %vm287_vm10, %v1927_v35  ;;  %1436 = vmatpush.msk.msra.mxu3 %vm1325_vm7, %v832_v12 }
 0x68d   :  { %1417 = vmatpush.xpose.msk.msra.mxu1 %vm287_vm10, %v828_v37  ;;  %1027 = vmatpush.msrb.mxu2 %v1776_v20  ;;  %v826_v20 = vsel %vm1323_vm8, %v820_v51, 0.0 }
 0x68e   :  { %1437 = vmatpush.msk.msra.mxu3 %vm1323_vm8, %v834_v3 }
 0x690   :  { %1438 = vmatpush.msk.msra.mxu3 %vm1323_vm8, %v832_v12 }
 0x691   :  { %v631_v39 = vpop.f32.mrf.mxu1  ;;  %1418 = vmatpush.xpose.msk.msra.mxu1 %vm287_vm10, %v827_v36 }
 0x692   :  { %v1947_v40 = vadd.f32 %v631_v39, %v1831_v57  ;;  %1439 = vmatpush.msk.msra.mxu3 %vm1321_vm9, %v834_v3 }
 0x694   :  { %1407 = vmatmul.msk.f32.gmra.mxu2 %vm287_vm10, %v1947_v40  ;;  %1440 = vmatpush.msk.msra.mxu3 %vm1321_vm9, %v832_v12 }
 0x695   :  { %1419 = vmatpush.xpose.msk.msra.mxu1 %vm287_vm10, %v826_v20 }
 0x696   :  { %1452 = vmatpush.msk.msrb.mxu3 %vm1327_vm6, %v1559_v38 }
 0x698   :  { %1453 = vmatpush.msk.msrb.mxu3 %vm1325_vm7, %v1559_v38 }
 0x699   :  { %1420 = vmatpush.xpose.msk.msra.mxu1 %vm287_vm10, %v825_v41 }
 0x69a   :  { %1454 = vmatpush.msk.msrb.mxu3 %vm1323_vm8, %v1559_v38 }
 0x69b   :  { %v810_v43 = vpop.f32.mrf.mxu0 }
 0x69c   :  { %1455 = vmatpush.msk.msrb.mxu3 %vm1321_vm9, %v1559_v38  ;;  %v1977_v44 = vadd.f32 %v1611_v5, %v810_v43  ;;  %v1987_v38 = vld [vmem:[%s2093_s2 + $0x74] ss:$0 sm:$0xff]  ;;  %s1560_s2 = smov [#allocation2]  }
 0x69d   :  { %1421 = vmatpush.xpose.msk.msra.mxu1 %vm287_vm10, %v824_v42 }
 0x6a1   :  { %1422 = vmatpush.xpose.msk.msra.mxu1 %vm287_vm10, %v823_v45 }
 0x6a4   :  { %1423 = vmatmul.msk.f32.vlgmr.msra.gmra.mxu1 %vm287_vm10, %v1977_v44 }
 0x6a5   :  { %1207 = vmatpush.msrb.mxu1 %v32_v9 }
 0x6a7   :  { %1208 = vmatpush.msrb.mxu1 %v31_v13 }
 0x6a9   :  { %1209 = vmatpush.msrb.mxu1 %v30_v46 }
 0x6ab   :  { %1210 = vmatpush.msrb.mxu1 %v29_v47 }
 0x70f   :  { %v660_v48 = vpop.f32.mrf.mxu2 }
 0x710   :  { %v1990_v5 = vadd.f32 %v1987_v38, %v660_v48 }
 0x712   :  { %v1993_v0 = vmul.f32 0.70710677, %v1990_v5 }
 0x714   :  { %v670_v49 = vand.u32 2147483647, %v1993_v0  ;;  %vm736_vm5 = vcmp.ge.f32.partialorder %v1993_v0, 0.0 }
 0x716   :  { %v672_v53 = vmul.f32 0.3275911, %v670_v49  ;;  %v724_v26 = vmul.f32 %v670_v49, %v670_v49 }
 0x717   :  { %v663_v54 = vpop.f32.mrf.mxu2 }
 0x718   :  { %v674_v56 = vadd.f32 1.0, %v672_v53  ;;  %v1997_v57 = vadd.f32 %v1987_v38, %v663_v54  ;;  %v726_v31 = vsub.f32 0.0, %v724_v26 }
 0x71a   :  { %1497 = vrcp.f32 %v674_v56  ;;  %v2000_v58 = vmul.f32 0.70710677, %v1997_v57  ;;  %v687_v8 = vand.u32 2147483648, %v674_v56  ;;  %v685_v16 = vand.u32 2147483647, %v674_v56 }
 0x71b   :  { %vm681_vm13 = vweird.f32 %v674_v56  ;;  %v728_v51 = vmul.f32 1.442695, %v726_v31  ;;  %v667_v0 = vmul.f32 0.5, %v1997_v57 }
 0x71c   :  { %v671_v59 = vand.u32 2147483647, %v2000_v58  ;;  %v688_v18 = vor.u32 1.1754944e-38, %v687_v8  ;;  %vm686_vm1 = vcmp.eq.f32.partialorder %v685_v16, 8.507059e+37 }
 0x71e   :  { %v673_v60 = vmul.f32 0.3275911, %v671_v59  ;;  %v725_v12 = vmul.f32 %v671_v59, %v671_v59 }
 0x720   :  { %v1498_v61 = vpop.eup %1497  ;;  %v675_v63 = vadd.f32 1.0, %v673_v60  ;;  %v727_v39 = vsub.f32 0.0, %v725_v12 }
 0x721   :  { %v677_v62 = vmul.f32 %v1498_v61, %v674_v56  ;;  %v889_v2 = vpop.f32.mrf.mxu1  ;;  %vm682_vm2 = vweird.f32 %v1498_v61 }
 0x722   :  { %v2003_v6 = vmul.f32 0.17677669, %v889_v2  ;;  %1499 = vrcp.f32 %v675_v63  ;;  %vm683_vm15 = vmor %vm681_vm13, %vm682_vm2  ;;  %v702_v30 = vand.u32 2147483648, %v675_v63  ;;  %v700_v33 = vand.u32 2147483647, %v675_v63 }
 0x723   :  { %v678_v7 = vsub.f32 1.0, %v677_v62  ;;  %vm696_vm11 = vweird.f32 %v675_v63  ;;  %1501 = vpow2.f32 %v728_v51  ;;  %v730_v45 = vmul.f32 1.442695, %v727_v39 }
 0x724   :  { %v893_v11 = vsel %vm336_vm14, %v2003_v6, -inf  ;;  %v703_v47 = vor.u32 1.1754944e-38, %v702_v30  ;;  %vm701_vm4 = vcmp.eq.f32.partialorder %v700_v33, 8.507059e+37  ;;  %vm737_vm2 = vcmp.ge.f32.partialorder %v2000_v58, 0.0 }
 0x725   :  { %v679_v14 = vmul.f32 %v1498_v61, %v678_v7  ;;  %894 = vmax.xlane.f32.xlu0 %v893_v11  ;;  %1503 = vpow2.f32 %v730_v45 }
 0x727   :  { %v680_v17 = vadd.f32 %v1498_v61, %v679_v14 }
 0x728   :  { %v1500_v21 = vpop.eup %1499 }
 0x729   :  { %v684_v24 = vsel %vm683_vm15, %v1498_v61, %v680_v17  ;;  %v692_v27 = vmul.f32 %v1500_v21, %v675_v63  ;;  %vm697_vm3 = vweird.f32 %v1500_v21  ;;  %v1502_v48 = vpop.eup %1501  ;;  %v666_v63 = vmul.f32 0.5, %v1990_v5 }
 0x72a   :  { %v689_v25 = vsel %vm686_vm1, %v688_v18, %v684_v24  ;;  %vm698_vm12 = vmor %vm696_vm11, %vm697_vm3 }
 0x72b   :  { %v706_v1 = vmul.f32 1.0614054, %v689_v25  ;;  %v693_v28 = vsub.f32 1.0, %v692_v27  ;;  %v1504_v8 = vpop.eup %1503 }
 0x72d   :  { %v708_v29 = vadd.f32 -1.4531521, %v706_v1  ;;  %v694_v32 = vmul.f32 %v1500_v21, %v693_v28 }
 0x72f   :  { %v710_v9 = vmul.f32 %v708_v29, %v689_v25  ;;  %v695_v13 = vadd.f32 %v1500_v21, %v694_v32 }
 0x731   :  { %v712_v46 = vadd.f32 1.4214138, %v710_v9  ;;  %v699_v52 = vsel %vm698_vm12, %v1500_v21, %v695_v13 }
 0x732   :  { %v704_v10 = vsel %vm701_vm4, %v703_v47, %v699_v52 }
 0x733   :  { %v714_v3 = vmul.f32 %v712_v46, %v689_v25  ;;  %v707_v15 = vmul.f32 1.0614054, %v704_v10 }
 0x735   :  { %v716_v34 = vadd.f32 -0.28449672, %v714_v3  ;;  %v709_v37 = vadd.f32 -1.4531521, %v707_v15 }
 0x737   :  { %v718_v36 = vmul.f32 %v716_v34, %v689_v25  ;;  %v711_v20 = vmul.f32 %v709_v37, %v704_v10 }
 0x739   :  { %v720_v41 = vadd.f32 0.2548296, %v718_v36  ;;  %v713_v42 = vadd.f32 1.4214138, %v711_v20 }
 0x73b   :  { %v722_v43 = vmul.f32 %v720_v41, %v689_v25  ;;  %v715_v49 = vmul.f32 %v713_v42, %v704_v10 }
 0x73d   :  { %v732_v53 = vmul.f32 %v1502_v48, %v722_v43  ;;  %v717_v54 = vadd.f32 -0.28449672, %v715_v49 }
 0x73f   :  { %v734_v56 = vsub.f32 1.0, %v732_v53  ;;  %v719_v60 = vmul.f32 %v717_v54, %v704_v10 }
 0x741   :  { %v738_v61 = vsub.f32 0.0, %v734_v56  ;;  %v721_v59 = vadd.f32 0.2548296, %v719_v60 }
 0x743   :  { %v740_v62 = vsel %vm736_vm5, %v734_v56, %v738_v61  ;;  %v723_v7 = vmul.f32 %v721_v59, %v704_v10 }
 0x744   :  { %v742_v2 = vadd.f32 1.0, %v740_v62 }
 0x745   :  { %v733_v14 = vmul.f32 %v1504_v8, %v723_v7 }
 0x746   :  { %v744_v11 = vmul.f32 %v742_v2, %v666_v63 }
 0x747   :  { %v735_v17 = vsub.f32 1.0, %v733_v14 }
 0x748   :  { %v746_v16 = vadd.f32 %v744_v11, %v1927_v35 }
 0x749   :  { %v739_v18 = vsub.f32 0.0, %v735_v17 }
 0x74a   :  { %748 = vst.msk [vmem:[#allocation2] sm:$0xff] %vm287_vm10, %v746_v16 }
 0x74b   :  { %v741_v21 = vsel %vm737_vm2, %v735_v17, %v739_v18 }
 0x74c   :  { %v743_v24 = vadd.f32 1.0, %v741_v21 }
 0x74e   :  { %v745_v25 = vmul.f32 %v743_v24, %v667_v0 }
 0x750   :  { %v747_v5 = vadd.f32 %v745_v25, %v1947_v40 }
 0x752   :  { %749 = vst.msk [vmem:[#allocation2 + $0x8] sm:$0xff] %vm287_vm10, %v747_v5 }
 0x798   :  { %v895_v26 = vpop.xlane.xlu0 %894 }
 0x799   :  { %v896_v27 = vsub.f32 %v2003_v6, %v895_v26 }
 0x79b   :  { %v897_v1 = vmul.f32 1.442695, %v896_v27 }
 0x79d   :  { %1505 = vpow2.f32 %v897_v1 }
 0x7a3   :  { %v1506_v35 = vpop.eup %1505 }
 0x7a4   :  { %1432 = vmatmul.msk.f32.vlgmr.msra.gmra.mxu2 %vm336_vm14, %v1506_v35 }
 0x7ac   :  { %1443 = vmatmul.msk.f32.vlgmr.msrb.gmra.mxu2 %vm200_vm0, %v1850_v22 }
 0x7b4   :  { %1444 = vmatmul.msk.f32.gmra.mxu2 %vm200_vm0, %v1857_v23 }
 0x827   :  { %v919_v57 = vpop.f32.mrf.mxu2 }
 0x828   :  { %1507 = vrcp.f32 %v919_v57 }
 0x82e   :  { %v1508_v58 = vpop.eup %1507 }
 0x82f   :  { %v923_v40 = vmul.f32 %v1508_v58, %v1506_v35  ;;  %v1029_v11 = vpop.f32.mrf.mxu2 }
 0x831   :  { %1441 = vmatmul.msk.f32.vlgmr.msra.gmra.mxu3 %vm336_vm14, %v923_v40 }
 0x837   :  { %v1032_v17 = vpop.f32.mrf.mxu2 }
 0x838   :  { %v1033_v18 = vadd.f32 %v1819_v50, %v1032_v17 }
 0x8b4   :  { %v944_v28 = vpop.f32.mrf.mxu3 }
 0x8b5   :  { %v947_v6 = vadd.f32 %v944_v28, %v1977_v44 }
 0x8b7   :  { %1442 = vmatmul.msk.f32.vlgmr.msra.gmra.mxu0 %vm287_vm10, %v947_v6 }
 0x934   :  { %v968_v29 = vpop.f32.mrf.mxu0 }
 0x935   :  { %v969_v30 = vadd.f32 %v1746_v55, %v968_v29 }
 0x937   :  { %v972_v31 = vmul.f32 0.70710677, %v969_v30  ;;  %v971_v60 = vmul.f32 0.5, %v969_v30 }
 0x939   :  { %v973_v32 = vand.u32 2147483647, %v972_v31  ;;  %vm1006_vm1 = vcmp.ge.f32.partialorder %v972_v31, 0.0 }
 0x93b   :  { %v974_v22 = vmul.f32 0.3275911, %v973_v32  ;;  %v1000_v55 = vmul.f32 %v973_v32, %v973_v32 }
 0x93d   :  { %v975_v33 = vadd.f32 1.0, %v974_v22  ;;  %v1001_v34 = vsub.f32 0.0, %v1000_v55 }
 0x93f   :  { %1509 = vrcp.f32 %v975_v33  ;;  %v987_v46 = vand.u32 2147483648, %v975_v33  ;;  %v985_v51 = vand.u32 2147483647, %v975_v33  ;;  %vm981_vm14 = vweird.f32 %v975_v33 }
 0x940   :  { %v1002_v39 = vmul.f32 1.442695, %v1001_v34 }
 0x941   :  { %v988_v44 = vor.u32 1.1754944e-38, %v987_v46  ;;  %vm986_vm15 = vcmp.eq.f32.partialorder %v985_v51, 8.507059e+37 }
 0x942   :  { %1511 = vpow2.f32 %v1002_v39 }
 0x945   :  { %v1510_v23 = vpop.eup %1509 }
 0x946   :  { %v977_v9 = vmul.f32 %v1510_v23, %v975_v33  ;;  %vm982_vm0 = vweird.f32 %v1510_v23 }
 0x947   :  { %vm983_vm13 = vmor %vm981_vm14, %vm982_vm0 }
 0x948   :  { %v978_v13 = vsub.f32 1.0, %v977_v9  ;;  %v1512_v48 = vpop.eup %1511 }
 0x94a   :  { %v979_v47 = vmul.f32 %v1510_v23, %v978_v13 }
 0x94c   :  { %v980_v52 = vadd.f32 %v1510_v23, %v979_v47 }
 0x94e   :  { %v984_v3 = vsel %vm983_vm13, %v1510_v23, %v980_v52 }
 0x94f   :  { %v989_v10 = vsel %vm986_vm15, %v988_v44, %v984_v3 }
 0x950   :  { %v991_v12 = vmul.f32 1.0614054, %v989_v10 }
 0x952   :  { %v992_v15 = vadd.f32 -1.4531521, %v991_v12 }
 0x954   :  { %v993_v37 = vmul.f32 %v992_v15, %v989_v10 }
 0x956   :  { %v994_v36 = vadd.f32 1.4214138, %v993_v37 }
 0x958   :  { %v995_v20 = vmul.f32 %v994_v36, %v989_v10 }
 0x95a   :  { %v996_v41 = vadd.f32 -0.28449672, %v995_v20 }
 0x95c   :  { %v997_v42 = vmul.f32 %v996_v41, %v989_v10 }
 0x95e   :  { %v998_v43 = vadd.f32 0.2548296, %v997_v42 }
 0x960   :  { %v999_v45 = vmul.f32 %v998_v43, %v989_v10 }
 0x962   :  { %v1004_v49 = vmul.f32 %v1512_v48, %v999_v45 }
 0x964   :  { %v1005_v53 = vsub.f32 1.0, %v1004_v49 }
 0x966   :  { %v1007_v54 = vsub.f32 0.0, %v1005_v53 }
 0x968   :  { %v1008_v56 = vsel %vm1006_vm1, %v1005_v53, %v1007_v54 }
 0x969   :  { %v1009_v61 = vadd.f32 1.0, %v1008_v56 }
 0x96b   :  { %v1010_v59 = vmul.f32 %v1009_v61, %v971_v60 }
 0x96d   :  { %v1011_v62 = vadd.f32 %v1010_v59, %v947_v6 }
 0x96f   :  { %1445 = vmatmul.msk.f32.vlgmr.msrb.gmra.mxu0 %vm287_vm10, %v1011_v62 }
 0x9ec   :  { %v1055_v63 = vpop.f32.mrf.mxu0 }
 0x9ed   :  { %v1056_v2 = vadd.f32 %v1804_v4, %v1055_v63  ;;  %v1030_v4 = vadd.f32 %v1819_v50, %v1029_v11 }
 0x9ef   :  { %1063 = vrot.lane.b32.xlu0 %v1056_v2, %s1556_s22  ;;  %v1061_v7 = vsel %vm1327_vm6, %v1056_v2, 0.0  ;;  %v1060_v8 = vsel %vm1325_vm7, %v1056_v2, 0.0  ;;  %v1059_v14 = vsel %vm1323_vm8, %v1056_v2, 0.0  ;;  %v1058_v16 = vsel %vm1321_vm9, %v1056_v2, 0.0  ;;  %s1307_s22 = sshll.u32 %s1560_s2, 4  ;;  %s1308_s22 = int_to_ptr.vmem [resolvable:$true] %s1307_s22 }
 0x9f0   :  { %1446 = vmatpush.xpose.msk.msra.mxu2 %vm287_vm10, %v1061_v7 }
 0x9f4   :  { %1447 = vmatpush.xpose.msk.msra.mxu2 %vm287_vm10, %v1060_v8 }
 0x9f8   :  { %1448 = vmatpush.xpose.msk.msra.mxu2 %vm287_vm10, %v1059_v14 }
 0x9fc   :  { %1449 = vmatpush.xpose.msk.msra.mxu2 %vm287_vm10, %v1058_v16 }
 0x9ff   :  { %1450 = vmatmul.msk.f32.vlgmr.msra.gmra.mxu2 %vm287_vm10, %v1030_v4 }
 0xa07   :  { %1451 = vmatmul.msk.f32.gmra.mxu2 %vm287_vm10, %v1033_v18 }
 0xa61   :  { %v1064_v21 = vpop.permute.xlu0 %1063 }
 0xa62   :  { %1458 = vmatpush.msk.msra.mxu0 %vm1327_vm6, %v1064_v21 }
 0xa64   :  { %1459 = vmatpush.msk.msra.mxu0 %vm1325_vm7, %v1064_v21 }
 0xa66   :  { %1460 = vmatpush.msk.msra.mxu0 %vm1323_vm8, %v1064_v21 }
 0xa68   :  { %1461 = vmatpush.msk.msra.mxu0 %vm1321_vm9, %v1064_v21 }
 0xa82   :  { %v1105_v0 = vpop.f32.mrf.mxu2 }
 0xa83   :  { %v1111_v24 = vmul.f32 0.17677669, %v1105_v0 }
 0xa85   :  { %v1113_v25 = vsel %vm287_vm10, %v1111_v24, -inf }
 0xa86   :  { %1114 = vmax.xlane.f32.xlu2 %v1113_v25 }
 0xa8a   :  { %v1108_v50 = vpop.f32.mrf.mxu2 }
 0xa8b   :  { %v1112_v5 = vmul.f32 0.17677669, %v1108_v50 }
 0xa8d   :  { %v1116_v26 = vsel %vm287_vm10, %v1112_v5, -inf }
 0xa8e   :  { %1117 = vmax.xlane.f32.xlu1 %v1116_v26 }
 0xaf9   :  { %v1115_v27 = vpop.xlane.xlu2 %1114 }
 0xafa   :  { %v1119_v1 = vsub.f32 %v1111_v24, %v1115_v27 }
 0xafc   :  { %v1121_v35 = vmul.f32 1.442695, %v1119_v1 }
 0xafe   :  { %1513 = vpow2.f32 %v1121_v35 }
 0xb01   :  { %v1118_v57 = vpop.xlane.xlu1 %1117 }
 0xb02   :  { %v1120_v58 = vsub.f32 %v1112_v5, %v1118_v57 }
 0xb04   :  { %v1514_v40 = vpop.eup %1513  ;;  %v1123_v28 = vmul.f32 1.442695, %v1120_v58 }
 0xb05   :  { %1456 = vmatmul.msk.f32.vlgmr.msrb.gmra.mxu3 %vm287_vm10, %v1514_v40 }
 0xb06   :  { %1515 = vpow2.f32 %v1123_v28 }
 0xb0c   :  { %v1516_v19 = vpop.eup %1515 }
 0xb0d   :  { %1457 = vmatmul.msk.f32.gmra.mxu3 %vm287_vm10, %v1516_v19 }
 0xb88   :  { %v1148_v6 = vpop.f32.mrf.mxu3 }
 0xb89   :  { %1517 = vrcp.f32 %v1148_v6 }
 0xb8f   :  { %v1518_v29 = vpop.eup %1517 }
 0xb90   :  { %v1156_v30 = vmul.f32 %v1518_v29, %v1514_v40  ;;  %v1151_v31 = vpop.f32.mrf.mxu3 }
 0xb91   :  { %1519 = vrcp.f32 %v1151_v31 }
 0xb92   :  { %1462 = vmatmul.msk.f32.vlgmr.msra.gmra.mxu0 %vm287_vm10, %v1156_v30 }
 0xb97   :  { %v1520_v32 = vpop.eup %1519 }
 0xb98   :  { %v1157_v22 = vmul.f32 %v1520_v32, %v1516_v19 }
 0xb9a   :  { %1463 = vmatmul.msk.f32.gmra.mxu0 %vm287_vm10, %v1157_v22 }
 0xc0f   :  { %v1181_v33 = vpop.f32.mrf.mxu0 }
 0xc10   :  { %v2058_v23 = vadd.f32 %v1181_v33, %v1030_v4 }
 0xc12   :  { %1464 = vmatmul.msk.f32.vlgmr.msrb.gmra.mxu1 %vm287_vm10, %v2058_v23 }
 0xc17   :  { %v1184_v9 = vpop.f32.mrf.mxu0 }
 0xc18   :  { %v2062_v13 = vadd.f32 %v1184_v9, %v1033_v18 }
 0xc1a   :  { %1465 = vmatmul.msk.f32.gmra.mxu1 %vm287_vm10, %v2062_v13 }
 0xc8f   :  { %v1212_v46 = vpop.f32.mrf.mxu1 }
 0xc90   :  { %v2067_v47 = vadd.f32 %v1987_v38, %v1212_v46 }
 0xc92   :  { %v2070_v51 = vmul.f32 0.70710677, %v2067_v47  ;;  %v1218_v33 = vmul.f32 0.5, %v2067_v47 }
 0xc94   :  { %v1222_v52 = vand.u32 2147483647, %v2070_v51  ;;  %vm1288_vm5 = vcmp.ge.f32.partialorder %v2070_v51, 0.0 }
 0xc96   :  { %v1224_v44 = vmul.f32 0.3275911, %v1222_v52  ;;  %v1276_v54 = vmul.f32 %v1222_v52, %v1222_v52 }
 0xc97   :  { %v1215_v3 = vpop.f32.mrf.mxu1 }
 0xc98   :  { %v1226_v10 = vadd.f32 1.0, %v1224_v44  ;;  %v2074_v55 = vadd.f32 %v1987_v38, %v1215_v3  ;;  %v1278_v63 = vsub.f32 0.0, %v1276_v54 }
 0xc9a   :  { %1521 = vrcp.f32 %v1226_v10  ;;  %v2077_v12 = vmul.f32 0.70710677, %v2074_v55  ;;  %v1239_v41 = vand.u32 2147483648, %v1226_v10  ;;  %v1237_v43 = vand.u32 2147483647, %v1226_v10 }
 0xc9b   :  { %vm1233_vm7 = vweird.f32 %v1226_v10  ;;  %v1280_v16 = vmul.f32 1.442695, %v1278_v63  ;;  %v1219_v51 = vmul.f32 0.5, %v2074_v55 }
 0xc9c   :  { %v1223_v15 = vand.u32 2147483647, %v2077_v12  ;;  %v1240_v38 = vor.u32 1.1754944e-38, %v1239_v41  ;;  %vm1238_vm9 = vcmp.eq.f32.partialorder %v1237_v43, 8.507059e+37  ;;  %vm1289_vm2 = vcmp.ge.f32.partialorder %v2077_v12, 0.0 }
 0xc9e   :  { %v1225_v34 = vmul.f32 0.3275911, %v1223_v15  ;;  %v1277_v0 = vmul.f32 %v1223_v15, %v1223_v15 }
 0xca0   :  { %v1522_v37 = vpop.eup %1521  ;;  %v1227_v39 = vadd.f32 1.0, %v1225_v34  ;;  %v1279_v26 = vsub.f32 0.0, %v1277_v0 }
 0xca1   :  { %v1229_v36 = vmul.f32 %v1522_v37, %v1226_v10  ;;  %vm1234_vm6 = vweird.f32 %v1522_v37 }
 0xca2   :  { %1523 = vrcp.f32 %v1227_v39  ;;  %vm1235_vm8 = vmor %vm1233_vm7, %vm1234_vm6  ;;  %v1254_v62 = vand.u32 2147483648, %v1227_v39  ;;  %v1252_v7 = vand.u32 2147483647, %v1227_v39  ;;  %vm1248_vm11 = vweird.f32 %v1227_v39 }
 0xca3   :  { %v1230_v20 = vsub.f32 1.0, %v1229_v36  ;;  %1525 = vpow2.f32 %v1280_v16  ;;  %v1282_v58 = vmul.f32 1.442695, %v1279_v26 }
 0xca4   :  { %v1255_v4 = vor.u32 1.1754944e-38, %v1254_v62  ;;  %vm1253_vm4 = vcmp.eq.f32.partialorder %v1252_v7, 8.507059e+37 }
 0xca5   :  { %v1231_v42 = vmul.f32 %v1522_v37, %v1230_v20  ;;  %1527 = vpow2.f32 %v1282_v58 }
 0xca7   :  { %v1232_v45 = vadd.f32 %v1522_v37, %v1231_v42 }
 0xca8   :  { %v1524_v48 = vpop.eup %1523 }
 0xca9   :  { %v1236_v49 = vsel %vm1235_vm8, %v1522_v37, %v1232_v45  ;;  %v1244_v56 = vmul.f32 %v1524_v48, %v1227_v39  ;;  %vm1249_vm3 = vweird.f32 %v1524_v48  ;;  %v1526_v40 = vpop.eup %1525 }
 0xcaa   :  { %v1241_v53 = vsel %vm1238_vm9, %v1240_v38, %v1236_v49  ;;  %vm1250_vm12 = vmor %vm1248_vm11, %vm1249_vm3 }
 0xcab   :  { %v1258_v60 = vmul.f32 1.0614054, %v1241_v53  ;;  %v1245_v61 = vsub.f32 1.0, %v1244_v56  ;;  %v1528_v52 = vpop.eup %1527 }
 0xcad   :  { %v1260_v59 = vadd.f32 -1.4531521, %v1258_v60  ;;  %v1246_v2 = vmul.f32 %v1524_v48, %v1245_v61 }
 0xcaf   :  { %v1262_v8 = vmul.f32 %v1260_v59, %v1241_v53  ;;  %v1247_v11 = vadd.f32 %v1524_v48, %v1246_v2 }
 0xcb1   :  { %v1264_v14 = vadd.f32 1.4214138, %v1262_v8  ;;  %v1251_v17 = vsel %vm1250_vm12, %v1524_v48, %v1247_v11 }
 0xcb2   :  { %v1256_v21 = vsel %vm1253_vm4, %v1255_v4, %v1251_v17 }
 0xcb3   :  { %v1266_v18 = vmul.f32 %v1264_v14, %v1241_v53  ;;  %v1259_v24 = vmul.f32 1.0614054, %v1256_v21 }
 0xcb5   :  { %v1268_v25 = vadd.f32 -0.28449672, %v1266_v18  ;;  %v1261_v50 = vadd.f32 -1.4531521, %v1259_v24 }
 0xcb7   :  { %v1270_v5 = vmul.f32 %v1268_v25, %v1241_v53  ;;  %v1263_v27 = vmul.f32 %v1261_v50, %v1256_v21 }
 0xcb9   :  { %v1272_v1 = vadd.f32 0.2548296, %v1270_v5  ;;  %v1265_v35 = vadd.f32 1.4214138, %v1263_v27 }
 0xcbb   :  { %v1274_v57 = vmul.f32 %v1272_v1, %v1241_v53  ;;  %v1267_v28 = vmul.f32 %v1265_v35, %v1256_v21 }
 0xcbd   :  { %v1284_v19 = vmul.f32 %v1526_v40, %v1274_v57  ;;  %v1269_v6 = vadd.f32 -0.28449672, %v1267_v28 }
 0xcbf   :  { %v1286_v29 = vsub.f32 1.0, %v1284_v19  ;;  %v1271_v30 = vmul.f32 %v1269_v6, %v1256_v21 }
 0xcc1   :  { %v1290_v31 = vsub.f32 0.0, %v1286_v29  ;;  %v1273_v32 = vadd.f32 0.2548296, %v1271_v30 }
 0xcc3   :  { %v1292_v22 = vsel %vm1288_vm5, %v1286_v29, %v1290_v31  ;;  %v1275_v46 = vmul.f32 %v1273_v32, %v1256_v21 }
 0xcc4   :  { %v1294_v9 = vadd.f32 1.0, %v1292_v22 }
 0xcc5   :  { %v1285_v3 = vmul.f32 %v1528_v52, %v1275_v46 }
 0xcc6   :  { %v1296_v44 = vmul.f32 %v1294_v9, %v1218_v33 }
 0xcc7   :  { %v1287_v15 = vsub.f32 1.0, %v1285_v3 }
 0xcc8   :  { %v1298_v10 = vadd.f32 %v1296_v44, %v2058_v23 }
 0xcc9   :  { %v1291_v34 = vsub.f32 0.0, %v1287_v15 }
 0xcca   :  { %1301 = vst.msk [vmem:[#allocation2 + $0x10] sm:$0xff] %vm287_vm10, %v1298_v10 }
 0xccb   :  { %v1293_v37 = vsel %vm1289_vm2, %v1287_v15, %v1291_v34 }
 0xccc   :  { %v1295_v36 = vadd.f32 1.0, %v1293_v37 }
 0xcce   :  { %v1297_v47 = vmul.f32 %v1295_v36, %v1219_v51 }
 0xcd0   :  { %v1299_v23 = vadd.f32 %v1297_v47, %v2062_v13 }
 0xcd2   :  { %1302 = vst.msk [vmem:[#allocation2 + $0x18] sm:$0xff] %vm287_vm10, %v1299_v23 }
 0xcd3   :  { %1315 = dma.vmem_to_hbm [thread:$0]  %s1308_s22, 512, %s1310_s11, [#allocation3], %s1561_s12, %s1561_s12, %s1562_s13  }
 0xcd4   :  { %1553 = dma.done.wait [#allocation3], 512  }
 0xcd5   :  { %1554 = vsyncadd [#allocation3], 4294966784 }
 0xcd6   :  { %1320 = vsyncpa [#allocation3], 1 }

</bundles_post_ra>
